<compile_context>
chip_gen: v5e
topology: v5e:2x2
jax: 0.10.0
libtpu: 0.0.40
codegen_flags: <defaults>
</compile_context>

<pallas_src>
import functools

import jax
import jax.numpy as jnp
import numpy as np
from jax.experimental import pallas as pl
from jax.experimental.pallas import tpu as pltpu


# ------------------------------ GRU gate math --------------------------------

def _gru_update(gx, gh, h, hidden):
    """One GRUCell state update from precomputed gate projections.

    gx = x @ W_ih^T + b_ih  : (B, 3H), PyTorch gate order [r, z, n]
    gh = h @ W_hh^T + b_hh  : (B, 3H)
    h' = (1 - z) * n + z * h,  n = tanh(gx_n + r * gh_n)
    """
    H = hidden
    rz = jax.nn.sigmoid(gx[:, :2 * H] + gh[:, :2 * H])   # wide-slab sigmoid (r|z)
    r = rz[:, :H]
    z = rz[:, H:]
    n = jnp.tanh(gx[:, 2 * H:] + r * gh[:, 2 * H:])
    return (1.0 - z) * n + z * h


# --------------------------------- kernel ------------------------------------

def gru_decoder_kernel(x_ref, h_ref,
                       w0ih_ref, b0ih_ref,
                       wa_ref, ba_ref,
                       w1hh_ref, b1hh_ref,
                       out_ref, hlast_ref,
                       *, seq_len, batch, hidden):
    S, B, H = seq_len, batch, hidden

    # Hoisted layer-0 input projection: one matmul covering every timestep.
    gx0_all = jnp.dot(x_ref[...], w0ih_ref[...],
                      preferred_element_type=jnp.float32) + b0ih_ref[...]   # (S*B, 3H)

    w_a = wa_ref[...]        # (H, 6H) = [W1_ih^T | W0_hh^T]
    b_a = ba_ref[...]        # (1, 6H) = [b1_ih   | b0_hh ]
    w1hh = w1hh_ref[...]     # (H, 3H) = W1_hh^T
    b1hh = b1hh_ref[...]     # (1, 3H)

    h_init = h_ref[...]      # (B, H)  initial state = encoder_h (both layers)
    h0 = h_init
    h1 = h_init

    # Hidden-side projections for step 0 (precomputed off the per-step chain).
    gh0 = jnp.dot(h_init, w_a[:, 3 * H:],
                  preferred_element_type=jnp.float32) + b_a[:, 3 * H:]       # (B, 3H)
    gh1 = jnp.dot(h_init, w1hh, preferred_element_type=jnp.float32) + b1hh   # (B, 3H)

    outs = []
    for t in range(S):       # small static trip count -> fully unrolled
        gx0 = gx0_all[t * B:(t + 1) * B, :]                                  # (B, 3H)
        h0 = _gru_update(gx0, gh0, h0, H)

        # One fused MXU launch: layer-1 input projection for THIS step and
        # layer-0 hidden projection for the NEXT step.
        a = jnp.dot(h0, w_a, preferred_element_type=jnp.float32) + b_a       # (B, 6H)
        gx1 = a[:, :3 * H]
        gh0 = a[:, 3 * H:]

        h1 = _gru_update(gx1, gh1, h1, H)
        outs.append(h1)

        if t + 1 < S:        # layer-1 hidden projection for the next step
            gh1 = jnp.dot(h1, w1hh, preferred_element_type=jnp.float32) + b1hh

    # Single lane-dense store: column s*H + h  ==  out[b, s, h].
    out_ref[...] = jnp.concatenate(outs, axis=-1).astype(out_ref.dtype)      # (B, S*H)
    hlast_ref[...] = h1.astype(hlast_ref.dtype)


# -------------------------------- wrapper -------------------------------------

def gru_decoder_forward(params, x, encoder_out=None, encoder_h=None,
                        inter_modal_out=None):
    """x: (B, S, I), encoder_h: (B, H).  Returns (out (B, S, H), h1 (B, H))."""
    if inter_modal_out is not None:
        # TODO(synk): inter_modal path needs the `Attention` class, which is not
        # defined in the reference file; only inter_modal_out=None is implemented.
        raise NotImplementedError("inter_modal_out path not implemented")
    del encoder_out   # unused by the module when inter_modal_out is None

    B, S, I = x.shape
    H = params['hidden_size']

    # Step-major flattening: row t*B + b == x[b, t, :].
    x2d = jnp.transpose(x, (1, 0, 2)).reshape(S * B, I)

    # One-time weight packing (cheap XLA ops, outside the kernel / outside the loop).
    w0ihT = params['w0_ih'].T                                                # (I, 3H)
    b0ih = params['b0_ih'].reshape(1, 3 * H)
    wa = jnp.concatenate([params['w1_ih'].T, params['w0_hh'].T], axis=1)     # (H, 6H)
    ba = jnp.concatenate([params['b1_ih'], params['b0_hh']]).reshape(1, 6 * H)
    w1hhT = params['w1_hh'].T                                                # (H, 3H)
    b1hh = params['b1_hh'].reshape(1, 3 * H)

    kernel = functools.partial(gru_decoder_kernel, seq_len=S, batch=B, hidden=H)
    vmem = pl.BlockSpec(memory_space=pltpu.MemorySpace.VMEM)     # whole array in VMEM

    out2d, h_last = pl.pallas_call(
        kernel,
        out_shape=(jax.ShapeDtypeStruct((B, S * H), jnp.float32),
                   jax.ShapeDtypeStruct((B, H), jnp.float32)),
        in_specs=[vmem] * 8,
        out_specs=(vmem, vmem),
    )(x2d, encoder_h, w0ihT, b0ih, wa, ba, w1hhT, b1hh)

    return out2d.reshape(B, S, H), h_last


# ---------------------------- pure-JAX reference ------------------------------

def _gru_cell_ref(x, h, w_ih, w_hh, b_ih, b_hh):
    H = h.shape[-1]
    hp = jax.lax.Precision.HIGHEST
    gx = jnp.dot(x, w_ih.T, precision=hp) + b_ih
    gh = jnp.dot(h, w_hh.T, precision=hp) + b_hh
    r = jax.nn.sigmoid(gx[:, :H] + gh[:, :H])
    z = jax.nn.sigmoid(gx[:, H:2 * H] + gh[:, H:2 * H])
    n = jnp.tanh(gx[:, 2 * H:] + r * gh[:, 2 * H:])
    return (1.0 - z) * n + z * h


def gru_decoder_reference(params, x, encoder_h):
    B, S, I = x.shape
    h0 = h1 = encoder_h
    outs = []
    for t in range(S):
        h0 = _gru_cell_ref(x[:, t], h0, params['w0_ih'], params['w0_hh'],
                           params['b0_ih'], params['b0_hh'])
        h1 = _gru_cell_ref(h0, h1, params['w1_ih'], params['w1_hh'],
                           params['b1_ih'], params['b1_hh'])
        outs.append(h1)
    return jnp.stack(outs, axis=1), h1


# ------------------------------- param init -----------------------------------

def init_params(key, input_size, hidden_size):
    H = hidden_size
    k = 1.0 / np.sqrt(H)
    shapes = {
        # PyTorch nn.GRUCell conventions: weight_ih (3H, in), weight_hh (3H, H),
        # biases (3H,), gate order [r, z, n].
        'w0_ih': (3 * H, input_size), 'w0_hh': (3 * H, H),
        'b0_ih': (3 * H,), 'b0_hh': (3 * H,),
        'w1_ih': (3 * H, H), 'w1_hh': (3 * H, H),
        'b1_ih': (3 * H,), 'b1_hh': (3 * H,),
    }
    params = {'hidden_size': H}
    keys = jax.random.split(key, len(shapes))
    for (name, shape), kk in zip(shapes.items(), keys):
        params[name] = jax.random.uniform(kk, shape, jnp.float32, -k, k)
    return params


# ---------------------------------- main ---------------------------------------

if __name__ == "__main__":
    B, S, I, H, T_ENC = 2, 8, 32, 32, 8

    root = jax.random.PRNGKey(0)
    k_p, k_x, k_eo, k_h = jax.random.split(root, 4)

    params = init_params(k_p, I, H)
    x = jax.random.normal(k_x, (B, S, I), jnp.float32)
    encoder_out = jax.random.normal(k_eo, (B, T_ENC, H), jnp.float32)   # unused on this path
    encoder_h = jax.random.normal(k_h, (B, H), jnp.float32)

    out, h_last = gru_decoder_forward(params, x, encoder_out, encoder_h)
    out = jax.block_until_ready(out)
    h_last = jax.block_until_ready(h_last)

    ref_out, ref_h = gru_decoder_reference(params, x, encoder_h)
    np.testing.assert_allclose(np.asarray(out), np.asarray(ref_out), rtol=2e-3, atol=2e-3)
    np.testing.assert_allclose(np.asarray(h_last), np.asarray(ref_h), rtol=2e-3, atol=2e-3)

    assert out.shape == (B, S, H) and h_last.shape == (B, H)
    print("KERNEL_OK")
</pallas_src>

<mosaic_0001>
module attributes {stable_mosaic.version = 11 : i64} {
  func.func @gru_decoder_kernel(%arg0: memref<16x32xf32, #tpu.memory_space<vmem>>, %arg1: memref<2x32xf32, #tpu.memory_space<vmem>>, %arg2: memref<32x96xf32, #tpu.memory_space<vmem>>, %arg3: memref<1x96xf32, #tpu.memory_space<vmem>>, %arg4: memref<32x192xf32, #tpu.memory_space<vmem>>, %arg5: memref<1x192xf32, #tpu.memory_space<vmem>>, %arg6: memref<32x96xf32, #tpu.memory_space<vmem>>, %arg7: memref<1x96xf32, #tpu.memory_space<vmem>>, %arg8: memref<2x256xf32, #tpu.memory_space<vmem>>, %arg9: memref<2x32xf32, #tpu.memory_space<vmem>>) attributes {dimension_semantics = [], scalar_prefetch = 0 : i64, scratch_operands = 0 : i64, tpu.core_type = #tpu.core_type<tc>} {
    %c0 = arith.constant 0 : index
    %c0_0 = arith.constant 0 : index
    %0 = vector.load %arg0[%c0, %c0_0] : memref<16x32xf32, #tpu.memory_space<vmem>>, vector<16x32xf32>
    %c0_1 = arith.constant 0 : index
    %c0_2 = arith.constant 0 : index
    %1 = vector.load %arg2[%c0_1, %c0_2] : memref<32x96xf32, #tpu.memory_space<vmem>>, vector<32x96xf32>
    %cst = arith.constant dense<0.000000e+00> : vector<16x96xf32>
    %2 = tpu.matmul %0, %1, %cst {dimension_numbers = #tpu.dot_dimension_numbers<[1], [0], [0], [1], [0, 0, 1, 1], [], []>} : vector<16x32xf32>, vector<32x96xf32>, vector<16x96xf32> -> vector<16x96xf32>
    %c0_3 = arith.constant 0 : index
    %c0_4 = arith.constant 0 : index
    %3 = vector.load %arg3[%c0_3, %c0_4] : memref<1x96xf32, #tpu.memory_space<vmem>>, vector<1x96xf32>
    %4 = vector.broadcast %3 : vector<1x96xf32> to vector<16x96xf32>
    %5 = arith.addf %2, %4 : vector<16x96xf32>
    %c0_5 = arith.constant 0 : index
    %c0_6 = arith.constant 0 : index
    %6 = vector.load %arg4[%c0_5, %c0_6] : memref<32x192xf32, #tpu.memory_space<vmem>>, vector<32x192xf32>
    %c0_7 = arith.constant 0 : index
    %c0_8 = arith.constant 0 : index
    %7 = vector.load %arg5[%c0_7, %c0_8] : memref<1x192xf32, #tpu.memory_space<vmem>>, vector<1x192xf32>
    %c0_9 = arith.constant 0 : index
    %c0_10 = arith.constant 0 : index
    %8 = vector.load %arg6[%c0_9, %c0_10] : memref<32x96xf32, #tpu.memory_space<vmem>>, vector<32x96xf32>
    %c0_11 = arith.constant 0 : index
    %c0_12 = arith.constant 0 : index
    %9 = vector.load %arg7[%c0_11, %c0_12] : memref<1x96xf32, #tpu.memory_space<vmem>>, vector<1x96xf32>
    %c0_13 = arith.constant 0 : index
    %c0_14 = arith.constant 0 : index
    %10 = vector.load %arg1[%c0_13, %c0_14] : memref<2x32xf32, #tpu.memory_space<vmem>>, vector<2x32xf32>
    %11 = vector.extract_strided_slice %6 {offsets = [0, 96], sizes = [32, 96], strides = [1, 1]} : vector<32x192xf32> to vector<32x96xf32>
    %cst_15 = arith.constant dense<0.000000e+00> : vector<2x96xf32>
    %12 = tpu.matmul %10, %11, %cst_15 {dimension_numbers = #tpu.dot_dimension_numbers<[1], [0], [0], [1], [0, 0, 1, 1], [], []>} : vector<2x32xf32>, vector<32x96xf32>, vector<2x96xf32> -> vector<2x96xf32>
    %13 = vector.extract_strided_slice %7 {offsets = [0, 96], sizes = [1, 96], strides = [1, 1]} : vector<1x192xf32> to vector<1x96xf32>
    %14 = vector.broadcast %13 : vector<1x96xf32> to vector<2x96xf32>
    %15 = arith.addf %12, %14 : vector<2x96xf32>
    %cst_16 = arith.constant dense<0.000000e+00> : vector<2x96xf32>
    %16 = tpu.matmul %10, %8, %cst_16 {dimension_numbers = #tpu.dot_dimension_numbers<[1], [0], [0], [1], [0, 0, 1, 1], [], []>} : vector<2x32xf32>, vector<32x96xf32>, vector<2x96xf32> -> vector<2x96xf32>
    %17 = vector.broadcast %9 : vector<1x96xf32> to vector<2x96xf32>
    %18 = arith.addf %16, %17 : vector<2x96xf32>
    %19 = vector.extract_strided_slice %5 {offsets = [0, 0], sizes = [2, 96], strides = [1, 1]} : vector<16x96xf32> to vector<2x96xf32>
    %20 = vector.extract_strided_slice %19 {offsets = [0, 0], sizes = [2, 64], strides = [1, 1]} : vector<2x96xf32> to vector<2x64xf32>
    %21 = vector.extract_strided_slice %15 {offsets = [0, 0], sizes = [2, 64], strides = [1, 1]} : vector<2x96xf32> to vector<2x64xf32>
    %22 = arith.addf %20, %21 : vector<2x64xf32>
    %23 = arith.negf %22 : vector<2x64xf32>
    %24 = math.exp %23 : vector<2x64xf32>
    %cst_17 = arith.constant 1.000000e+00 : f32
    %25 = vector.broadcast %cst_17 : f32 to vector<2x64xf32>
    %26 = arith.addf %25, %24 : vector<2x64xf32>
    %27 = arith.divf %25, %26 : vector<2x64xf32>
    %28 = vector.extract_strided_slice %27 {offsets = [0, 0], sizes = [2, 32], strides = [1, 1]} : vector<2x64xf32> to vector<2x32xf32>
    %29 = vector.extract_strided_slice %27 {offsets = [0, 32], sizes = [2, 32], strides = [1, 1]} : vector<2x64xf32> to vector<2x32xf32>
    %30 = vector.extract_strided_slice %19 {offsets = [0, 64], sizes = [2, 32], strides = [1, 1]} : vector<2x96xf32> to vector<2x32xf32>
    %31 = vector.extract_strided_slice %15 {offsets = [0, 64], sizes = [2, 32], strides = [1, 1]} : vector<2x96xf32> to vector<2x32xf32>
    %32 = arith.mulf %28, %31 : vector<2x32xf32>
    %33 = arith.addf %30, %32 : vector<2x32xf32>
    %34 = math.tanh %33 : vector<2x32xf32>
    %cst_18 = arith.constant 1.000000e+00 : f32
    %35 = vector.broadcast %cst_18 : f32 to vector<2x32xf32>
    %36 = arith.subf %35, %29 : vector<2x32xf32>
    %37 = arith.mulf %36, %34 : vector<2x32xf32>
    %38 = arith.mulf %29, %10 : vector<2x32xf32>
    %39 = arith.addf %37, %38 : vector<2x32xf32>
    %cst_19 = arith.constant dense<0.000000e+00> : vector<2x192xf32>
    %40 = tpu.matmul %39, %6, %cst_19 {dimension_numbers = #tpu.dot_dimension_numbers<[1], [0], [0], [1], [0, 0, 1, 1], [], []>} : vector<2x32xf32>, vector<32x192xf32>, vector<2x192xf32> -> vector<2x192xf32>
    %41 = vector.broadcast %7 : vector<1x192xf32> to vector<2x192xf32>
    %42 = arith.addf %40, %41 : vector<2x192xf32>
    %43 = vector.extract_strided_slice %42 {offsets = [0, 0], sizes = [2, 96], strides = [1, 1]} : vector<2x192xf32> to vector<2x96xf32>
    %44 = vector.extract_strided_slice %42 {offsets = [0, 96], sizes = [2, 96], strides = [1, 1]} : vector<2x192xf32> to vector<2x96xf32>
    %45 = vector.extract_strided_slice %43 {offsets = [0, 0], sizes = [2, 64], strides = [1, 1]} : vector<2x96xf32> to vector<2x64xf32>
    %46 = vector.extract_strided_slice %18 {offsets = [0, 0], sizes = [2, 64], strides = [1, 1]} : vector<2x96xf32> to vector<2x64xf32>
    %47 = arith.addf %45, %46 : vector<2x64xf32>
    %48 = arith.negf %47 : vector<2x64xf32>
    %49 = math.exp %48 : vector<2x64xf32>
    %cst_20 = arith.constant 1.000000e+00 : f32
    %50 = vector.broadcast %cst_20 : f32 to vector<2x64xf32>
    %51 = arith.addf %50, %49 : vector<2x64xf32>
    %52 = arith.divf %50, %51 : vector<2x64xf32>
    %53 = vector.extract_strided_slice %52 {offsets = [0, 0], sizes = [2, 32], strides = [1, 1]} : vector<2x64xf32> to vector<2x32xf32>
    %54 = vector.extract_strided_slice %52 {offsets = [0, 32], sizes = [2, 32], strides = [1, 1]} : vector<2x64xf32> to vector<2x32xf32>
    %55 = vector.extract_strided_slice %43 {offsets = [0, 64], sizes = [2, 32], strides = [1, 1]} : vector<2x96xf32> to vector<2x32xf32>
    %56 = vector.extract_strided_slice %18 {offsets = [0, 64], sizes = [2, 32], strides = [1, 1]} : vector<2x96xf32> to vector<2x32xf32>
    %57 = arith.mulf %53, %56 : vector<2x32xf32>
    %58 = arith.addf %55, %57 : vector<2x32xf32>
    %59 = math.tanh %58 : vector<2x32xf32>
    %cst_21 = arith.constant 1.000000e+00 : f32
    %60 = vector.broadcast %cst_21 : f32 to vector<2x32xf32>
    %61 = arith.subf %60, %54 : vector<2x32xf32>
    %62 = arith.mulf %61, %59 : vector<2x32xf32>
    %63 = arith.mulf %54, %10 : vector<2x32xf32>
    %64 = arith.addf %62, %63 : vector<2x32xf32>
    %cst_22 = arith.constant dense<0.000000e+00> : vector<2x96xf32>
    %65 = tpu.matmul %64, %8, %cst_22 {dimension_numbers = #tpu.dot_dimension_numbers<[1], [0], [0], [1], [0, 0, 1, 1], [], []>} : vector<2x32xf32>, vector<32x96xf32>, vector<2x96xf32> -> vector<2x96xf32>
    %66 = vector.broadcast %9 : vector<1x96xf32> to vector<2x96xf32>
    %67 = arith.addf %65, %66 : vector<2x96xf32>
    %68 = vector.extract_strided_slice %5 {offsets = [2, 0], sizes = [2, 96], strides = [1, 1]} : vector<16x96xf32> to vector<2x96xf32>
    %69 = vector.extract_strided_slice %68 {offsets = [0, 0], sizes = [2, 64], strides = [1, 1]} : vector<2x96xf32> to vector<2x64xf32>
    %70 = vector.extract_strided_slice %44 {offsets = [0, 0], sizes = [2, 64], strides = [1, 1]} : vector<2x96xf32> to vector<2x64xf32>
    %71 = arith.addf %69, %70 : vector<2x64xf32>
    %72 = arith.negf %71 : vector<2x64xf32>
    %73 = math.exp %72 : vector<2x64xf32>
    %cst_23 = arith.constant 1.000000e+00 : f32
    %74 = vector.broadcast %cst_23 : f32 to vector<2x64xf32>
    %75 = arith.addf %74, %73 : vector<2x64xf32>
    %76 = arith.divf %74, %75 : vector<2x64xf32>
    %77 = vector.extract_strided_slice %76 {offsets = [0, 0], sizes = [2, 32], strides = [1, 1]} : vector<2x64xf32> to vector<2x32xf32>
    %78 = vector.extract_strided_slice %76 {offsets = [0, 32], sizes = [2, 32], strides = [1, 1]} : vector<2x64xf32> to vector<2x32xf32>
    %79 = vector.extract_strided_slice %68 {offsets = [0, 64], sizes = [2, 32], strides = [1, 1]} : vector<2x96xf32> to vector<2x32xf32>
    %80 = vector.extract_strided_slice %44 {offsets = [0, 64], sizes = [2, 32], strides = [1, 1]} : vector<2x96xf32> to vector<2x32xf32>
    %81 = arith.mulf %77, %80 : vector<2x32xf32>
    %82 = arith.addf %79, %81 : vector<2x32xf32>
    %83 = math.tanh %82 : vector<2x32xf32>
    %cst_24 = arith.constant 1.000000e+00 : f32
    %84 = vector.broadcast %cst_24 : f32 to vector<2x32xf32>
    %85 = arith.subf %84, %78 : vector<2x32xf32>
    %86 = arith.mulf %85, %83 : vector<2x32xf32>
    %87 = arith.mulf %78, %39 : vector<2x32xf32>
    %88 = arith.addf %86, %87 : vector<2x32xf32>
    %cst_25 = arith.constant dense<0.000000e+00> : vector<2x192xf32>
    %89 = tpu.matmul %88, %6, %cst_25 {dimension_numbers = #tpu.dot_dimension_numbers<[1], [0], [0], [1], [0, 0, 1, 1], [], []>} : vector<2x32xf32>, vector<32x192xf32>, vector<2x192xf32> -> vector<2x192xf32>
    %90 = vector.broadcast %7 : vector<1x192xf32> to vector<2x192xf32>
    %91 = arith.addf %89, %90 : vector<2x192xf32>
    %92 = vector.extract_strided_slice %91 {offsets = [0, 0], sizes = [2, 96], strides = [1, 1]} : vector<2x192xf32> to vector<2x96xf32>
    %93 = vector.extract_strided_slice %91 {offsets = [0, 96], sizes = [2, 96], strides = [1, 1]} : vector<2x192xf32> to vector<2x96xf32>
    %94 = vector.extract_strided_slice %92 {offsets = [0, 0], sizes = [2, 64], strides = [1, 1]} : vector<2x96xf32> to vector<2x64xf32>
    %95 = vector.extract_strided_slice %67 {offsets = [0, 0], sizes = [2, 64], strides = [1, 1]} : vector<2x96xf32> to vector<2x64xf32>
    %96 = arith.addf %94, %95 : vector<2x64xf32>
    %97 = arith.negf %96 : vector<2x64xf32>
    %98 = math.exp %97 : vector<2x64xf32>
    %cst_26 = arith.constant 1.000000e+00 : f32
    %99 = vector.broadcast %cst_26 : f32 to vector<2x64xf32>
    %100 = arith.addf %99, %98 : vector<2x64xf32>
    %101 = arith.divf %99, %100 : vector<2x64xf32>
    %102 = vector.extract_strided_slice %101 {offsets = [0, 0], sizes = [2, 32], strides = [1, 1]} : vector<2x64xf32> to vector<2x32xf32>
    %103 = vector.extract_strided_slice %101 {offsets = [0, 32], sizes = [2, 32], strides = [1, 1]} : vector<2x64xf32> to vector<2x32xf32>
    %104 = vector.extract_strided_slice %92 {offsets = [0, 64], sizes = [2, 32], strides = [1, 1]} : vector<2x96xf32> to vector<2x32xf32>
    %105 = vector.extract_strided_slice %67 {offsets = [0, 64], sizes = [2, 32], strides = [1, 1]} : vector<2x96xf32> to vector<2x32xf32>
    %106 = arith.mulf %102, %105 : vector<2x32xf32>
    %107 = arith.addf %104, %106 : vector<2x32xf32>
    %108 = math.tanh %107 : vector<2x32xf32>
    %cst_27 = arith.constant 1.000000e+00 : f32
    %109 = vector.broadcast %cst_27 : f32 to vector<2x32xf32>
    %110 = arith.subf %109, %103 : vector<2x32xf32>
    %111 = arith.mulf %110, %108 : vector<2x32xf32>
    %112 = arith.mulf %103, %64 : vector<2x32xf32>
    %113 = arith.addf %111, %112 : vector<2x32xf32>
    %cst_28 = arith.constant dense<0.000000e+00> : vector<2x96xf32>
    %114 = tpu.matmul %113, %8, %cst_28 {dimension_numbers = #tpu.dot_dimension_numbers<[1], [0], [0], [1], [0, 0, 1, 1], [], []>} : vector<2x32xf32>, vector<32x96xf32>, vector<2x96xf32> -> vector<2x96xf32>
    %115 = vector.broadcast %9 : vector<1x96xf32> to vector<2x96xf32>
    %116 = arith.addf %114, %115 : vector<2x96xf32>
    %117 = vector.extract_strided_slice %5 {offsets = [4, 0], sizes = [2, 96], strides = [1, 1]} : vector<16x96xf32> to vector<2x96xf32>
    %118 = vector.extract_strided_slice %117 {offsets = [0, 0], sizes = [2, 64], strides = [1, 1]} : vector<2x96xf32> to vector<2x64xf32>
    %119 = vector.extract_strided_slice %93 {offsets = [0, 0], sizes = [2, 64], strides = [1, 1]} : vector<2x96xf32> to vector<2x64xf32>
    %120 = arith.addf %118, %119 : vector<2x64xf32>
    %121 = arith.negf %120 : vector<2x64xf32>
    %122 = math.exp %121 : vector<2x64xf32>
    %cst_29 = arith.constant 1.000000e+00 : f32
    %123 = vector.broadcast %cst_29 : f32 to vector<2x64xf32>
    %124 = arith.addf %123, %122 : vector<2x64xf32>
    %125 = arith.divf %123, %124 : vector<2x64xf32>
    %126 = vector.extract_strided_slice %125 {offsets = [0, 0], sizes = [2, 32], strides = [1, 1]} : vector<2x64xf32> to vector<2x32xf32>
    %127 = vector.extract_strided_slice %125 {offsets = [0, 32], sizes = [2, 32], strides = [1, 1]} : vector<2x64xf32> to vector<2x32xf32>
    %128 = vector.extract_strided_slice %117 {offsets = [0, 64], sizes = [2, 32], strides = [1, 1]} : vector<2x96xf32> to vector<2x32xf32>
    %129 = vector.extract_strided_slice %93 {offsets = [0, 64], sizes = [2, 32], strides = [1, 1]} : vector<2x96xf32> to vector<2x32xf32>
    %130 = arith.mulf %126, %129 : vector<2x32xf32>
    %131 = arith.addf %128, %130 : vector<2x32xf32>
    %132 = math.tanh %131 : vector<2x32xf32>
    %cst_30 = arith.constant 1.000000e+00 : f32
    %133 = vector.broadcast %cst_30 : f32 to vector<2x32xf32>
    %134 = arith.subf %133, %127 : vector<2x32xf32>
    %135 = arith.mulf %134, %132 : vector<2x32xf32>
    %136 = arith.mulf %127, %88 : vector<2x32xf32>
    %137 = arith.addf %135, %136 : vector<2x32xf32>
    %cst_31 = arith.constant dense<0.000000e+00> : vector<2x192xf32>
    %138 = tpu.matmul %137, %6, %cst_31 {dimension_numbers = #tpu.dot_dimension_numbers<[1], [0], [0], [1], [0, 0, 1, 1], [], []>} : vector<2x32xf32>, vector<32x192xf32>, vector<2x192xf32> -> vector<2x192xf32>
    %139 = vector.broadcast %7 : vector<1x192xf32> to vector<2x192xf32>
    %140 = arith.addf %138, %139 : vector<2x192xf32>
    %141 = vector.extract_strided_slice %140 {offsets = [0, 0], sizes = [2, 96], strides = [1, 1]} : vector<2x192xf32> to vector<2x96xf32>
    %142 = vector.extract_strided_slice %140 {offsets = [0, 96], sizes = [2, 96], strides = [1, 1]} : vector<2x192xf32> to vector<2x96xf32>
    %143 = vector.extract_strided_slice %141 {offsets = [0, 0], sizes = [2, 64], strides = [1, 1]} : vector<2x96xf32> to vector<2x64xf32>
    %144 = vector.extract_strided_slice %116 {offsets = [0, 0], sizes = [2, 64], strides = [1, 1]} : vector<2x96xf32> to vector<2x64xf32>
    %145 = arith.addf %143, %144 : vector<2x64xf32>
    %146 = arith.negf %145 : vector<2x64xf32>
    %147 = math.exp %146 : vector<2x64xf32>
    %cst_32 = arith.constant 1.000000e+00 : f32
    %148 = vector.broadcast %cst_32 : f32 to vector<2x64xf32>
    %149 = arith.addf %148, %147 : vector<2x64xf32>
    %150 = arith.divf %148, %149 : vector<2x64xf32>
    %151 = vector.extract_strided_slice %150 {offsets = [0, 0], sizes = [2, 32], strides = [1, 1]} : vector<2x64xf32> to vector<2x32xf32>
    %152 = vector.extract_strided_slice %150 {offsets = [0, 32], sizes = [2, 32], strides = [1, 1]} : vector<2x64xf32> to vector<2x32xf32>
    %153 = vector.extract_strided_slice %141 {offsets = [0, 64], sizes = [2, 32], strides = [1, 1]} : vector<2x96xf32> to vector<2x32xf32>
    %154 = vector.extract_strided_slice %116 {offsets = [0, 64], sizes = [2, 32], strides = [1, 1]} : vector<2x96xf32> to vector<2x32xf32>
    %155 = arith.mulf %151, %154 : vector<2x32xf32>
    %156 = arith.addf %153, %155 : vector<2x32xf32>
    %157 = math.tanh %156 : vector<2x32xf32>
    %cst_33 = arith.constant 1.000000e+00 : f32
    %158 = vector.broadcast %cst_33 : f32 to vector<2x32xf32>
    %159 = arith.subf %158, %152 : vector<2x32xf32>
    %160 = arith.mulf %159, %157 : vector<2x32xf32>
    %161 = arith.mulf %152, %113 : vector<2x32xf32>
    %162 = arith.addf %160, %161 : vector<2x32xf32>
    %cst_34 = arith.constant dense<0.000000e+00> : vector<2x96xf32>
    %163 = tpu.matmul %162, %8, %cst_34 {dimension_numbers = #tpu.dot_dimension_numbers<[1], [0], [0], [1], [0, 0, 1, 1], [], []>} : vector<2x32xf32>, vector<32x96xf32>, vector<2x96xf32> -> vector<2x96xf32>
    %164 = vector.broadcast %9 : vector<1x96xf32> to vector<2x96xf32>
    %165 = arith.addf %163, %164 : vector<2x96xf32>
    %166 = vector.extract_strided_slice %5 {offsets = [6, 0], sizes = [2, 96], strides = [1, 1]} : vector<16x96xf32> to vector<2x96xf32>
    %167 = vector.extract_strided_slice %166 {offsets = [0, 0], sizes = [2, 64], strides = [1, 1]} : vector<2x96xf32> to vector<2x64xf32>
    %168 = vector.extract_strided_slice %142 {offsets = [0, 0], sizes = [2, 64], strides = [1, 1]} : vector<2x96xf32> to vector<2x64xf32>
    %169 = arith.addf %167, %168 : vector<2x64xf32>
    %170 = arith.negf %169 : vector<2x64xf32>
    %171 = math.exp %170 : vector<2x64xf32>
    %cst_35 = arith.constant 1.000000e+00 : f32
    %172 = vector.broadcast %cst_35 : f32 to vector<2x64xf32>
    %173 = arith.addf %172, %171 : vector<2x64xf32>
    %174 = arith.divf %172, %173 : vector<2x64xf32>
    %175 = vector.extract_strided_slice %174 {offsets = [0, 0], sizes = [2, 32], strides = [1, 1]} : vector<2x64xf32> to vector<2x32xf32>
    %176 = vector.extract_strided_slice %174 {offsets = [0, 32], sizes = [2, 32], strides = [1, 1]} : vector<2x64xf32> to vector<2x32xf32>
    %177 = vector.extract_strided_slice %166 {offsets = [0, 64], sizes = [2, 32], strides = [1, 1]} : vector<2x96xf32> to vector<2x32xf32>
    %178 = vector.extract_strided_slice %142 {offsets = [0, 64], sizes = [2, 32], strides = [1, 1]} : vector<2x96xf32> to vector<2x32xf32>
    %179 = arith.mulf %175, %178 : vector<2x32xf32>
    %180 = arith.addf %177, %179 : vector<2x32xf32>
    %181 = math.tanh %180 : vector<2x32xf32>
    %cst_36 = arith.constant 1.000000e+00 : f32
    %182 = vector.broadcast %cst_36 : f32 to vector<2x32xf32>
    %183 = arith.subf %182, %176 : vector<2x32xf32>
    %184 = arith.mulf %183, %181 : vector<2x32xf32>
    %185 = arith.mulf %176, %137 : vector<2x32xf32>
    %186 = arith.addf %184, %185 : vector<2x32xf32>
    %cst_37 = arith.constant dense<0.000000e+00> : vector<2x192xf32>
    %187 = tpu.matmul %186, %6, %cst_37 {dimension_numbers = #tpu.dot_dimension_numbers<[1], [0], [0], [1], [0, 0, 1, 1], [], []>} : vector<2x32xf32>, vector<32x192xf32>, vector<2x192xf32> -> vector<2x192xf32>
    %188 = vector.broadcast %7 : vector<1x192xf32> to vector<2x192xf32>
    %189 = arith.addf %187, %188 : vector<2x192xf32>
    %190 = vector.extract_strided_slice %189 {offsets = [0, 0], sizes = [2, 96], strides = [1, 1]} : vector<2x192xf32> to vector<2x96xf32>
    %191 = vector.extract_strided_slice %189 {offsets = [0, 96], sizes = [2, 96], strides = [1, 1]} : vector<2x192xf32> to vector<2x96xf32>
    %192 = vector.extract_strided_slice %190 {offsets = [0, 0], sizes = [2, 64], strides = [1, 1]} : vector<2x96xf32> to vector<2x64xf32>
    %193 = vector.extract_strided_slice %165 {offsets = [0, 0], sizes = [2, 64], strides = [1, 1]} : vector<2x96xf32> to vector<2x64xf32>
    %194 = arith.addf %192, %193 : vector<2x64xf32>
    %195 = arith.negf %194 : vector<2x64xf32>
    %196 = math.exp %195 : vector<2x64xf32>
    %cst_38 = arith.constant 1.000000e+00 : f32
    %197 = vector.broadcast %cst_38 : f32 to vector<2x64xf32>
    %198 = arith.addf %197, %196 : vector<2x64xf32>
    %199 = arith.divf %197, %198 : vector<2x64xf32>
    %200 = vector.extract_strided_slice %199 {offsets = [0, 0], sizes = [2, 32], strides = [1, 1]} : vector<2x64xf32> to vector<2x32xf32>
    %201 = vector.extract_strided_slice %199 {offsets = [0, 32], sizes = [2, 32], strides = [1, 1]} : vector<2x64xf32> to vector<2x32xf32>
    %202 = vector.extract_strided_slice %190 {offsets = [0, 64], sizes = [2, 32], strides = [1, 1]} : vector<2x96xf32> to vector<2x32xf32>
    %203 = vector.extract_strided_slice %165 {offsets = [0, 64], sizes = [2, 32], strides = [1, 1]} : vector<2x96xf32> to vector<2x32xf32>
    %204 = arith.mulf %200, %203 : vector<2x32xf32>
    %205 = arith.addf %202, %204 : vector<2x32xf32>
    %206 = math.tanh %205 : vector<2x32xf32>
    %cst_39 = arith.constant 1.000000e+00 : f32
    %207 = vector.broadcast %cst_39 : f32 to vector<2x32xf32>
    %208 = arith.subf %207, %201 : vector<2x32xf32>
    %209 = arith.mulf %208, %206 : vector<2x32xf32>
    %210 = arith.mulf %201, %162 : vector<2x32xf32>
    %211 = arith.addf %209, %210 : vector<2x32xf32>
    %cst_40 = arith.constant dense<0.000000e+00> : vector<2x96xf32>
    %212 = tpu.matmul %211, %8, %cst_40 {dimension_numbers = #tpu.dot_dimension_numbers<[1], [0], [0], [1], [0, 0, 1, 1], [], []>} : vector<2x32xf32>, vector<32x96xf32>, vector<2x96xf32> -> vector<2x96xf32>
    %213 = vector.broadcast %9 : vector<1x96xf32> to vector<2x96xf32>
    %214 = arith.addf %212, %213 : vector<2x96xf32>
    %215 = vector.extract_strided_slice %5 {offsets = [8, 0], sizes = [2, 96], strides = [1, 1]} : vector<16x96xf32> to vector<2x96xf32>
    %216 = vector.extract_strided_slice %215 {offsets = [0, 0], sizes = [2, 64], strides = [1, 1]} : vector<2x96xf32> to vector<2x64xf32>
    %217 = vector.extract_strided_slice %191 {offsets = [0, 0], sizes = [2, 64], strides = [1, 1]} : vector<2x96xf32> to vector<2x64xf32>
    %218 = arith.addf %216, %217 : vector<2x64xf32>
    %219 = arith.negf %218 : vector<2x64xf32>
    %220 = math.exp %219 : vector<2x64xf32>
    %cst_41 = arith.constant 1.000000e+00 : f32
    %221 = vector.broadcast %cst_41 : f32 to vector<2x64xf32>
    %222 = arith.addf %221, %220 : vector<2x64xf32>
    %223 = arith.divf %221, %222 : vector<2x64xf32>
    %224 = vector.extract_strided_slice %223 {offsets = [0, 0], sizes = [2, 32], strides = [1, 1]} : vector<2x64xf32> to vector<2x32xf32>
    %225 = vector.extract_strided_slice %223 {offsets = [0, 32], sizes = [2, 32], strides = [1, 1]} : vector<2x64xf32> to vector<2x32xf32>
    %226 = vector.extract_strided_slice %215 {offsets = [0, 64], sizes = [2, 32], strides = [1, 1]} : vector<2x96xf32> to vector<2x32xf32>
    %227 = vector.extract_strided_slice %191 {offsets = [0, 64], sizes = [2, 32], strides = [1, 1]} : vector<2x96xf32> to vector<2x32xf32>
    %228 = arith.mulf %224, %227 : vector<2x32xf32>
    %229 = arith.addf %226, %228 : vector<2x32xf32>
    %230 = math.tanh %229 : vector<2x32xf32>
    %cst_42 = arith.constant 1.000000e+00 : f32
    %231 = vector.broadcast %cst_42 : f32 to vector<2x32xf32>
    %232 = arith.subf %231, %225 : vector<2x32xf32>
    %233 = arith.mulf %232, %230 : vector<2x32xf32>
    %234 = arith.mulf %225, %186 : vector<2x32xf32>
    %235 = arith.addf %233, %234 : vector<2x32xf32>
    %cst_43 = arith.constant dense<0.000000e+00> : vector<2x192xf32>
    %236 = tpu.matmul %235, %6, %cst_43 {dimension_numbers = #tpu.dot_dimension_numbers<[1], [0], [0], [1], [0, 0, 1, 1], [], []>} : vector<2x32xf32>, vector<32x192xf32>, vector<2x192xf32> -> vector<2x192xf32>
    %237 = vector.broadcast %7 : vector<1x192xf32> to vector<2x192xf32>
    %238 = arith.addf %236, %237 : vector<2x192xf32>
    %239 = vector.extract_strided_slice %238 {offsets = [0, 0], sizes = [2, 96], strides = [1, 1]} : vector<2x192xf32> to vector<2x96xf32>
    %240 = vector.extract_strided_slice %238 {offsets = [0, 96], sizes = [2, 96], strides = [1, 1]} : vector<2x192xf32> to vector<2x96xf32>
    %241 = vector.extract_strided_slice %239 {offsets = [0, 0], sizes = [2, 64], strides = [1, 1]} : vector<2x96xf32> to vector<2x64xf32>
    %242 = vector.extract_strided_slice %214 {offsets = [0, 0], sizes = [2, 64], strides = [1, 1]} : vector<2x96xf32> to vector<2x64xf32>
    %243 = arith.addf %241, %242 : vector<2x64xf32>
    %244 = arith.negf %243 : vector<2x64xf32>
    %245 = math.exp %244 : vector<2x64xf32>
    %cst_44 = arith.constant 1.000000e+00 : f32
    %246 = vector.broadcast %cst_44 : f32 to vector<2x64xf32>
    %247 = arith.addf %246, %245 : vector<2x64xf32>
    %248 = arith.divf %246, %247 : vector<2x64xf32>
    %249 = vector.extract_strided_slice %248 {offsets = [0, 0], sizes = [2, 32], strides = [1, 1]} : vector<2x64xf32> to vector<2x32xf32>
    %250 = vector.extract_strided_slice %248 {offsets = [0, 32], sizes = [2, 32], strides = [1, 1]} : vector<2x64xf32> to vector<2x32xf32>
    %251 = vector.extract_strided_slice %239 {offsets = [0, 64], sizes = [2, 32], strides = [1, 1]} : vector<2x96xf32> to vector<2x32xf32>
    %252 = vector.extract_strided_slice %214 {offsets = [0, 64], sizes = [2, 32], strides = [1, 1]} : vector<2x96xf32> to vector<2x32xf32>
    %253 = arith.mulf %249, %252 : vector<2x32xf32>
    %254 = arith.addf %251, %253 : vector<2x32xf32>
    %255 = math.tanh %254 : vector<2x32xf32>
    %cst_45 = arith.constant 1.000000e+00 : f32
    %256 = vector.broadcast %cst_45 : f32 to vector<2x32xf32>
    %257 = arith.subf %256, %250 : vector<2x32xf32>
    %258 = arith.mulf %257, %255 : vector<2x32xf32>
    %259 = arith.mulf %250, %211 : vector<2x32xf32>
    %260 = arith.addf %258, %259 : vector<2x32xf32>
    %cst_46 = arith.constant dense<0.000000e+00> : vector<2x96xf32>
    %261 = tpu.matmul %260, %8, %cst_46 {dimension_numbers = #tpu.dot_dimension_numbers<[1], [0], [0], [1], [0, 0, 1, 1], [], []>} : vector<2x32xf32>, vector<32x96xf32>, vector<2x96xf32> -> vector<2x96xf32>
    %262 = vector.broadcast %9 : vector<1x96xf32> to vector<2x96xf32>
    %263 = arith.addf %261, %262 : vector<2x96xf32>
    %264 = vector.extract_strided_slice %5 {offsets = [10, 0], sizes = [2, 96], strides = [1, 1]} : vector<16x96xf32> to vector<2x96xf32>
    %265 = vector.extract_strided_slice %264 {offsets = [0, 0], sizes = [2, 64], strides = [1, 1]} : vector<2x96xf32> to vector<2x64xf32>
    %266 = vector.extract_strided_slice %240 {offsets = [0, 0], sizes = [2, 64], strides = [1, 1]} : vector<2x96xf32> to vector<2x64xf32>
    %267 = arith.addf %265, %266 : vector<2x64xf32>
    %268 = arith.negf %267 : vector<2x64xf32>
    %269 = math.exp %268 : vector<2x64xf32>
    %cst_47 = arith.constant 1.000000e+00 : f32
    %270 = vector.broadcast %cst_47 : f32 to vector<2x64xf32>
    %271 = arith.addf %270, %269 : vector<2x64xf32>
    %272 = arith.divf %270, %271 : vector<2x64xf32>
    %273 = vector.extract_strided_slice %272 {offsets = [0, 0], sizes = [2, 32], strides = [1, 1]} : vector<2x64xf32> to vector<2x32xf32>
    %274 = vector.extract_strided_slice %272 {offsets = [0, 32], sizes = [2, 32], strides = [1, 1]} : vector<2x64xf32> to vector<2x32xf32>
    %275 = vector.extract_strided_slice %264 {offsets = [0, 64], sizes = [2, 32], strides = [1, 1]} : vector<2x96xf32> to vector<2x32xf32>
    %276 = vector.extract_strided_slice %240 {offsets = [0, 64], sizes = [2, 32], strides = [1, 1]} : vector<2x96xf32> to vector<2x32xf32>
    %277 = arith.mulf %273, %276 : vector<2x32xf32>
    %278 = arith.addf %275, %277 : vector<2x32xf32>
    %279 = math.tanh %278 : vector<2x32xf32>
    %cst_48 = arith.constant 1.000000e+00 : f32
    %280 = vector.broadcast %cst_48 : f32 to vector<2x32xf32>
    %281 = arith.subf %280, %274 : vector<2x32xf32>
    %282 = arith.mulf %281, %279 : vector<2x32xf32>
    %283 = arith.mulf %274, %235 : vector<2x32xf32>
    %284 = arith.addf %282, %283 : vector<2x32xf32>
    %cst_49 = arith.constant dense<0.000000e+00> : vector<2x192xf32>
    %285 = tpu.matmul %284, %6, %cst_49 {dimension_numbers = #tpu.dot_dimension_numbers<[1], [0], [0], [1], [0, 0, 1, 1], [], []>} : vector<2x32xf32>, vector<32x192xf32>, vector<2x192xf32> -> vector<2x192xf32>
    %286 = vector.broadcast %7 : vector<1x192xf32> to vector<2x192xf32>
    %287 = arith.addf %285, %286 : vector<2x192xf32>
    %288 = vector.extract_strided_slice %287 {offsets = [0, 0], sizes = [2, 96], strides = [1, 1]} : vector<2x192xf32> to vector<2x96xf32>
    %289 = vector.extract_strided_slice %287 {offsets = [0, 96], sizes = [2, 96], strides = [1, 1]} : vector<2x192xf32> to vector<2x96xf32>
    %290 = vector.extract_strided_slice %288 {offsets = [0, 0], sizes = [2, 64], strides = [1, 1]} : vector<2x96xf32> to vector<2x64xf32>
    %291 = vector.extract_strided_slice %263 {offsets = [0, 0], sizes = [2, 64], strides = [1, 1]} : vector<2x96xf32> to vector<2x64xf32>
    %292 = arith.addf %290, %291 : vector<2x64xf32>
    %293 = arith.negf %292 : vector<2x64xf32>
    %294 = math.exp %293 : vector<2x64xf32>
    %cst_50 = arith.constant 1.000000e+00 : f32
    %295 = vector.broadcast %cst_50 : f32 to vector<2x64xf32>
    %296 = arith.addf %295, %294 : vector<2x64xf32>
    %297 = arith.divf %295, %296 : vector<2x64xf32>
    %298 = vector.extract_strided_slice %297 {offsets = [0, 0], sizes = [2, 32], strides = [1, 1]} : vector<2x64xf32> to vector<2x32xf32>
    %299 = vector.extract_strided_slice %297 {offsets = [0, 32], sizes = [2, 32], strides = [1, 1]} : vector<2x64xf32> to vector<2x32xf32>
    %300 = vector.extract_strided_slice %288 {offsets = [0, 64], sizes = [2, 32], strides = [1, 1]} : vector<2x96xf32> to vector<2x32xf32>
    %301 = vector.extract_strided_slice %263 {offsets = [0, 64], sizes = [2, 32], strides = [1, 1]} : vector<2x96xf32> to vector<2x32xf32>
    %302 = arith.mulf %298, %301 : vector<2x32xf32>
    %303 = arith.addf %300, %302 : vector<2x32xf32>
    %304 = math.tanh %303 : vector<2x32xf32>
    %cst_51 = arith.constant 1.000000e+00 : f32
    %305 = vector.broadcast %cst_51 : f32 to vector<2x32xf32>
    %306 = arith.subf %305, %299 : vector<2x32xf32>
    %307 = arith.mulf %306, %304 : vector<2x32xf32>
    %308 = arith.mulf %299, %260 : vector<2x32xf32>
    %309 = arith.addf %307, %308 : vector<2x32xf32>
    %cst_52 = arith.constant dense<0.000000e+00> : vector<2x96xf32>
    %310 = tpu.matmul %309, %8, %cst_52 {dimension_numbers = #tpu.dot_dimension_numbers<[1], [0], [0], [1], [0, 0, 1, 1], [], []>} : vector<2x32xf32>, vector<32x96xf32>, vector<2x96xf32> -> vector<2x96xf32>
    %311 = vector.broadcast %9 : vector<1x96xf32> to vector<2x96xf32>
    %312 = arith.addf %310, %311 : vector<2x96xf32>
    %313 = vector.extract_strided_slice %5 {offsets = [12, 0], sizes = [2, 96], strides = [1, 1]} : vector<16x96xf32> to vector<2x96xf32>
    %314 = vector.extract_strided_slice %313 {offsets = [0, 0], sizes = [2, 64], strides = [1, 1]} : vector<2x96xf32> to vector<2x64xf32>
    %315 = vector.extract_strided_slice %289 {offsets = [0, 0], sizes = [2, 64], strides = [1, 1]} : vector<2x96xf32> to vector<2x64xf32>
    %316 = arith.addf %314, %315 : vector<2x64xf32>
    %317 = arith.negf %316 : vector<2x64xf32>
    %318 = math.exp %317 : vector<2x64xf32>
    %cst_53 = arith.constant 1.000000e+00 : f32
    %319 = vector.broadcast %cst_53 : f32 to vector<2x64xf32>
    %320 = arith.addf %319, %318 : vector<2x64xf32>
    %321 = arith.divf %319, %320 : vector<2x64xf32>
    %322 = vector.extract_strided_slice %321 {offsets = [0, 0], sizes = [2, 32], strides = [1, 1]} : vector<2x64xf32> to vector<2x32xf32>
    %323 = vector.extract_strided_slice %321 {offsets = [0, 32], sizes = [2, 32], strides = [1, 1]} : vector<2x64xf32> to vector<2x32xf32>
    %324 = vector.extract_strided_slice %313 {offsets = [0, 64], sizes = [2, 32], strides = [1, 1]} : vector<2x96xf32> to vector<2x32xf32>
    %325 = vector.extract_strided_slice %289 {offsets = [0, 64], sizes = [2, 32], strides = [1, 1]} : vector<2x96xf32> to vector<2x32xf32>
    %326 = arith.mulf %322, %325 : vector<2x32xf32>
    %327 = arith.addf %324, %326 : vector<2x32xf32>
    %328 = math.tanh %327 : vector<2x32xf32>
    %cst_54 = arith.constant 1.000000e+00 : f32
    %329 = vector.broadcast %cst_54 : f32 to vector<2x32xf32>
    %330 = arith.subf %329, %323 : vector<2x32xf32>
    %331 = arith.mulf %330, %328 : vector<2x32xf32>
    %332 = arith.mulf %323, %284 : vector<2x32xf32>
    %333 = arith.addf %331, %332 : vector<2x32xf32>
    %cst_55 = arith.constant dense<0.000000e+00> : vector<2x192xf32>
    %334 = tpu.matmul %333, %6, %cst_55 {dimension_numbers = #tpu.dot_dimension_numbers<[1], [0], [0], [1], [0, 0, 1, 1], [], []>} : vector<2x32xf32>, vector<32x192xf32>, vector<2x192xf32> -> vector<2x192xf32>
    %335 = vector.broadcast %7 : vector<1x192xf32> to vector<2x192xf32>
    %336 = arith.addf %334, %335 : vector<2x192xf32>
    %337 = vector.extract_strided_slice %336 {offsets = [0, 0], sizes = [2, 96], strides = [1, 1]} : vector<2x192xf32> to vector<2x96xf32>
    %338 = vector.extract_strided_slice %336 {offsets = [0, 96], sizes = [2, 96], strides = [1, 1]} : vector<2x192xf32> to vector<2x96xf32>
    %339 = vector.extract_strided_slice %337 {offsets = [0, 0], sizes = [2, 64], strides = [1, 1]} : vector<2x96xf32> to vector<2x64xf32>
    %340 = vector.extract_strided_slice %312 {offsets = [0, 0], sizes = [2, 64], strides = [1, 1]} : vector<2x96xf32> to vector<2x64xf32>
    %341 = arith.addf %339, %340 : vector<2x64xf32>
    %342 = arith.negf %341 : vector<2x64xf32>
    %343 = math.exp %342 : vector<2x64xf32>
    %cst_56 = arith.constant 1.000000e+00 : f32
    %344 = vector.broadcast %cst_56 : f32 to vector<2x64xf32>
    %345 = arith.addf %344, %343 : vector<2x64xf32>
    %346 = arith.divf %344, %345 : vector<2x64xf32>
    %347 = vector.extract_strided_slice %346 {offsets = [0, 0], sizes = [2, 32], strides = [1, 1]} : vector<2x64xf32> to vector<2x32xf32>
    %348 = vector.extract_strided_slice %346 {offsets = [0, 32], sizes = [2, 32], strides = [1, 1]} : vector<2x64xf32> to vector<2x32xf32>
    %349 = vector.extract_strided_slice %337 {offsets = [0, 64], sizes = [2, 32], strides = [1, 1]} : vector<2x96xf32> to vector<2x32xf32>
    %350 = vector.extract_strided_slice %312 {offsets = [0, 64], sizes = [2, 32], strides = [1, 1]} : vector<2x96xf32> to vector<2x32xf32>
    %351 = arith.mulf %347, %350 : vector<2x32xf32>
    %352 = arith.addf %349, %351 : vector<2x32xf32>
    %353 = math.tanh %352 : vector<2x32xf32>
    %cst_57 = arith.constant 1.000000e+00 : f32
    %354 = vector.broadcast %cst_57 : f32 to vector<2x32xf32>
    %355 = arith.subf %354, %348 : vector<2x32xf32>
    %356 = arith.mulf %355, %353 : vector<2x32xf32>
    %357 = arith.mulf %348, %309 : vector<2x32xf32>
    %358 = arith.addf %356, %357 : vector<2x32xf32>
    %cst_58 = arith.constant dense<0.000000e+00> : vector<2x96xf32>
    %359 = tpu.matmul %358, %8, %cst_58 {dimension_numbers = #tpu.dot_dimension_numbers<[1], [0], [0], [1], [0, 0, 1, 1], [], []>} : vector<2x32xf32>, vector<32x96xf32>, vector<2x96xf32> -> vector<2x96xf32>
    %360 = vector.broadcast %9 : vector<1x96xf32> to vector<2x96xf32>
    %361 = arith.addf %359, %360 : vector<2x96xf32>
    %362 = vector.extract_strided_slice %5 {offsets = [14, 0], sizes = [2, 96], strides = [1, 1]} : vector<16x96xf32> to vector<2x96xf32>
    %363 = vector.extract_strided_slice %362 {offsets = [0, 0], sizes = [2, 64], strides = [1, 1]} : vector<2x96xf32> to vector<2x64xf32>
    %364 = vector.extract_strided_slice %338 {offsets = [0, 0], sizes = [2, 64], strides = [1, 1]} : vector<2x96xf32> to vector<2x64xf32>
    %365 = arith.addf %363, %364 : vector<2x64xf32>
    %366 = arith.negf %365 : vector<2x64xf32>
    %367 = math.exp %366 : vector<2x64xf32>
    %cst_59 = arith.constant 1.000000e+00 : f32
    %368 = vector.broadcast %cst_59 : f32 to vector<2x64xf32>
    %369 = arith.addf %368, %367 : vector<2x64xf32>
    %370 = arith.divf %368, %369 : vector<2x64xf32>
    %371 = vector.extract_strided_slice %370 {offsets = [0, 0], sizes = [2, 32], strides = [1, 1]} : vector<2x64xf32> to vector<2x32xf32>
    %372 = vector.extract_strided_slice %370 {offsets = [0, 32], sizes = [2, 32], strides = [1, 1]} : vector<2x64xf32> to vector<2x32xf32>
    %373 = vector.extract_strided_slice %362 {offsets = [0, 64], sizes = [2, 32], strides = [1, 1]} : vector<2x96xf32> to vector<2x32xf32>
    %374 = vector.extract_strided_slice %338 {offsets = [0, 64], sizes = [2, 32], strides = [1, 1]} : vector<2x96xf32> to vector<2x32xf32>
    %375 = arith.mulf %371, %374 : vector<2x32xf32>
    %376 = arith.addf %373, %375 : vector<2x32xf32>
    %377 = math.tanh %376 : vector<2x32xf32>
    %cst_60 = arith.constant 1.000000e+00 : f32
    %378 = vector.broadcast %cst_60 : f32 to vector<2x32xf32>
    %379 = arith.subf %378, %372 : vector<2x32xf32>
    %380 = arith.mulf %379, %377 : vector<2x32xf32>
    %381 = arith.mulf %372, %333 : vector<2x32xf32>
    %382 = arith.addf %380, %381 : vector<2x32xf32>
    %cst_61 = arith.constant dense<0.000000e+00> : vector<2x192xf32>
    %383 = tpu.matmul %382, %6, %cst_61 {dimension_numbers = #tpu.dot_dimension_numbers<[1], [0], [0], [1], [0, 0, 1, 1], [], []>} : vector<2x32xf32>, vector<32x192xf32>, vector<2x192xf32> -> vector<2x192xf32>
    %384 = vector.broadcast %7 : vector<1x192xf32> to vector<2x192xf32>
    %385 = arith.addf %383, %384 : vector<2x192xf32>
    %386 = vector.extract_strided_slice %385 {offsets = [0, 0], sizes = [2, 96], strides = [1, 1]} : vector<2x192xf32> to vector<2x96xf32>
    %387 = vector.extract_strided_slice %386 {offsets = [0, 0], sizes = [2, 64], strides = [1, 1]} : vector<2x96xf32> to vector<2x64xf32>
    %388 = vector.extract_strided_slice %361 {offsets = [0, 0], sizes = [2, 64], strides = [1, 1]} : vector<2x96xf32> to vector<2x64xf32>
    %389 = arith.addf %387, %388 : vector<2x64xf32>
    %390 = arith.negf %389 : vector<2x64xf32>
    %391 = math.exp %390 : vector<2x64xf32>
    %cst_62 = arith.constant 1.000000e+00 : f32
    %392 = vector.broadcast %cst_62 : f32 to vector<2x64xf32>
    %393 = arith.addf %392, %391 : vector<2x64xf32>
    %394 = arith.divf %392, %393 : vector<2x64xf32>
    %395 = vector.extract_strided_slice %394 {offsets = [0, 0], sizes = [2, 32], strides = [1, 1]} : vector<2x64xf32> to vector<2x32xf32>
    %396 = vector.extract_strided_slice %394 {offsets = [0, 32], sizes = [2, 32], strides = [1, 1]} : vector<2x64xf32> to vector<2x32xf32>
    %397 = vector.extract_strided_slice %386 {offsets = [0, 64], sizes = [2, 32], strides = [1, 1]} : vector<2x96xf32> to vector<2x32xf32>
    %398 = vector.extract_strided_slice %361 {offsets = [0, 64], sizes = [2, 32], strides = [1, 1]} : vector<2x96xf32> to vector<2x32xf32>
    %399 = arith.mulf %395, %398 : vector<2x32xf32>
    %400 = arith.addf %397, %399 : vector<2x32xf32>
    %401 = math.tanh %400 : vector<2x32xf32>
    %cst_63 = arith.constant 1.000000e+00 : f32
    %402 = vector.broadcast %cst_63 : f32 to vector<2x32xf32>
    %403 = arith.subf %402, %396 : vector<2x32xf32>
    %404 = arith.mulf %403, %401 : vector<2x32xf32>
    %405 = arith.mulf %396, %358 : vector<2x32xf32>
    %406 = arith.addf %404, %405 : vector<2x32xf32>
    %407 = tpu.concatenate %64, %113, %162, %211, %260, %309, %358, %406 in 1 : vector<2x32xf32>, vector<2x32xf32>, vector<2x32xf32>, vector<2x32xf32>, vector<2x32xf32>, vector<2x32xf32>, vector<2x32xf32>, vector<2x32xf32> -> vector<2x256xf32>
    %c0_64 = arith.constant 0 : index
    %c0_65 = arith.constant 0 : index
    %408 = vector.load %arg8[%c0_64, %c0_65] : memref<2x256xf32, #tpu.memory_space<vmem>>, vector<2x256xf32>
    tpu.vector_store %arg8[%c0_64, %c0_65], %407 {strides = array<i32>} : memref<2x256xf32, #tpu.memory_space<vmem>>, vector<2x256xf32>,
    %c0_66 = arith.constant 0 : index
    %c0_67 = arith.constant 0 : index
    %409 = vector.load %arg9[%c0_66, %c0_67] : memref<2x32xf32, #tpu.memory_space<vmem>>, vector<2x32xf32>
    tpu.vector_store %arg9[%c0_66, %c0_67], %406 {strides = array<i32>} : memref<2x32xf32, #tpu.memory_space<vmem>>, vector<2x32xf32>,
    return
  }
}

</mosaic_0001>

<bundles_post_ra>
// kernel: tpu_custom_call.1
= control target key start
LH: loop header
LB: loop body
LE: loop exit
PB: predicated region body
PF: predicated region fallthrough
CT: control target
= control target key end

     0   :  { %15 = vsyncpa [#allocation3], 0  ;;  %s2402_s0 = inlined_call_operand.hbm [shape: f32[16,32], index: 0, kind: input, shape index: {}]   ;;  %s2403_s1 = inlined_call_operand.hbm [shape: f32[2,32], index: 1, kind: input, shape index: {}]   ;;  %s2404_s2 = inlined_call_operand.hbm [shape: f32[32,96], index: 2, kind: input, shape index: {}]   ;;  %s2405_s3 = inlined_call_operand.vmem [shape: f32[1,96], index: 3, kind: input, shape index: {}]   ;;  %s2406_s4 = inlined_call_operand.hbm [shape: f32[32,192], index: 4, kind: input, shape index: {}]   ;;  %s2407_s5 = inlined_call_operand.vmem [shape: f32[1,192], index: 5, kind: input, shape index: {}]   ;;  %s2408_s6 = inlined_call_operand.hbm [shape: f32[32,96], index: 6, kind: input, shape index: {}]   ;;  %s2409_s7 = inlined_call_operand.vmem [shape: f32[1,96], index: 7, kind: input, shape index: {}]   ;;  %s2410_s8 = inlined_call_operand.hbm [shape: f32[2,256], index: 8, kind: output, shape index: {0}]   ;;  %s2411_s9 = inlined_call_operand.hbm [shape: f32[2,32], index: 9, kind: output, shape index: {1}]  }
   0x1   :  { %16 = vsyncpa [#allocation6], 0 }
   0x2   :  { %17 = vsyncpa [#allocation9], 0 }
   0x3   :  { %18 = vsyncpa [#allocation4], 0  ;;  %s38_s11 = sshll.u32 %s2403_s1, 4  ;;  %s39_s11 = int_to_ptr.hbm [resolvable:$true] %s38_s11 }
   0x4   :  { %19 = vsyncpa [#allocation13], 0  ;;  %s1906_s12 = smov [#allocation5]   ;;  %s63_s16 = sshll.u32 %s2406_s4, 4  ;;  %s64_s16 = int_to_ptr.hbm [resolvable:$true] %s63_s16 }
   0x5   :  { %s40_s13 = sshll.u32 %s1906_s12, 4  ;;  %s1907_s17 = smov [#allocation8]   ;;  %s41_s13 = int_to_ptr.vmem [resolvable:$true] %s40_s13 }
   0x6   :  { %43 = dma.hbm_to_vmem [thread:$0]  %s39_s11, 32, %s41_s13, [#allocation6]  }
   0x7   :  { %s65_s18 = sshll.u32 %s1907_s17, 4  ;;  %s1908_s19 = smov 256   ;;  %s66_s18 = int_to_ptr.vmem [resolvable:$true] %s65_s18 }
   0x8   :  { %s1909_s20 = smov 16   ;;  %s24_s1 = sshll.u32 %s2402_s0, 4  ;;  %s25_s1 = int_to_ptr.hbm [resolvable:$true] %s24_s1 }
   0x9   :  { %71 = dma.hbm_to_vmem [thread:$0]  %s64_s16, 1024, %s66_s18, [#allocation9], %s1908_s19, %s1908_s19, %s1909_s20  }
   0xa   :  { %s1910_s23 = smov [#allocation2]   ;;  %s48_s4 = sshll.u32 %s2404_s2, 4  ;;  %s49_s4 = int_to_ptr.hbm [resolvable:$true] %s48_s4 }
   0xb   :  { %s26_s24 = sshll.u32 %s1910_s23, 4  ;;  %s1911_s27 = smov 128   ;;  %s27_s24 = int_to_ptr.vmem [resolvable:$true] %s26_s24 }
   0xc   :  { %s1912_s28 = smov 8   ;;  %s1913_s29 = smov [#allocation7]  }
   0xd   :  { %32 = dma.hbm_to_vmem [thread:$0]  %s25_s1, 256, %s27_s24, [#allocation3], %s1911_s27, %s1911_s27, %s1912_s28  }
   0xe   :  { %s50_s30 = sshll.u32 %s1913_s29, 4  ;;  %s78_s12 = sshll.u32 %s2408_s6, 4  ;;  %s51_s30 = int_to_ptr.vmem [resolvable:$true] %s50_s30  ;;  %s79_s12 = int_to_ptr.hbm [resolvable:$true] %s78_s12 }
   0xf   :  { %56 = dma.hbm_to_vmem [thread:$0]  %s49_s4, 512, %s51_s30, [#allocation6], %s1911_s27, %s1911_s27, %s1912_s28  }
  0x10   :  { %s1914_s0 = smov [#allocation10]  }
  0x11   :  { %s80_s13 = sshll.u32 %s1914_s0, 4  ;;  %s81_s13 = int_to_ptr.vmem [resolvable:$true] %s80_s13 }
  0x12   :  { %86 = dma.hbm_to_vmem [thread:$0]  %s79_s12, 512, %s81_s13, [#allocation9], %s1911_s27, %s1911_s27, %s1912_s28  }
  0x13   :  { %1896 = dma.done.wait [#allocation3], 256  }
  0x14   :  { %1897 = vsyncadd [#allocation3], 4294967040 }
  0x15   :  { %1898 = dma.done.wait [#allocation6], 544  }
  0x16   :  { %1899 = vsyncadd [#allocation6], 4294966752 }
  0x17   :  { %1900 = dma.done.wait [#allocation9], 1536  }
  0x18   :  { %1901 = vsyncadd [#allocation9], 4294965760  ;;  %v1985_v0 = vld [vmem:[#allocation8 + $0x30] sm:$0xff]  ;;  %v1987_v1 = vld [vmem:[#allocation8 + $0x38] sm:$0xff]  ;;  %s1915_s2 = smov 32   ;;  %vm119_vm0 = vcmask 261120  }
  0x19   :  { %v1989_v2 = vld [vmem:[#allocation8 + $0x10] sm:$0xff]  ;;  %v1601_v3 = vpack.i.bf16 %v1987_v1, %v1985_v0  ;;  %v1993_v4 = vld [vmem:[#allocation8 + $0x18] sm:$0xff]  ;;  %312 = vmatpush.msra.mxu3 %v1985_v0  ;;  %v1998_v6 = vld [vmem:[#allocation8 + $0x20] sm:$0xff]  ;;  %s1517_s23 = sshll.u32 %s2410_s8, 4  ;;  %s1919_s24 = smov [#allocation12]   ;;  %s1518_s23 = int_to_ptr.hbm [resolvable:$true] %s1517_s23 }
  0x1a   :  { %v1611_v5 = vpack.i.bf16 %v1993_v4, %v1989_v2  ;;  %v2003_v7 = vld [vmem:[#allocation8 + $0x28] sm:$0xff]  ;;  %v2005_v8 = vld [vmem:[#allocation8] sm:$0xff]  ;;  %v114_v12 = vld [vmem:[#allocation7 + $0x18] sm:$0xff]  ;;  %s1526_s25 = sshll.u32 %s1919_s24, 4  ;;  %s1528_s27 = sshll.u32 %s2411_s9, 4  ;;  %s1527_s25 = int_to_ptr.vmem [resolvable:$true] %s1526_s25  ;;  %s1529_s27 = int_to_ptr.hbm [resolvable:$true] %s1528_s27 }
  0x1b   :  { %1602 = vrot.lane.b32.xlu0 %v1601_v3, %s1915_s2  ;;  %313 = vmatpush.msra.mxu3 %v1998_v6  ;;  %v2007_v9 = vld [vmem:[#allocation8 + $0x8] sm:$0xff]  ;;  %v1606_v10 = vpack.i.bf16 %v2003_v7, %v1998_v6  ;;  %v113_v13 = vld [vmem:[#allocation7 + $0x10] sm:$0xff]  ;;  %v111_v15 = vld [vmem:[#allocation7] sm:$0xff] }
  0x1c   :  { %1612 = vrot.lane.b32.xlu1 %v1611_v5, %s1915_s2  ;;  %v1616_v11 = vpack.i.bf16 %v2007_v9, %v2005_v8  ;;  %138 = vmatpush.msra.mxu0 %v114_v12  ;;  %v112_v14 = vld [vmem:[#allocation7 + $0x8] sm:$0xff]  ;;  %v163_v36 = vld [vmem:[#allocation5] sm:$0x3]  ;;  %v2063_v5 = vld [vmem:[#allocation10 + $0x10] sm:$0xff] }
  0x1d   :  { %314 = vmatpush.msra.mxu3 %v1989_v2  ;;  %v109_v16 = vld [vmem:[#allocation2] sm:$0xff]  ;;  %v2061_v3 = vld [vmem:[#allocation10 + $0x18] sm:$0xff] }
  0x1e   :  { %139 = vmatpush.msra.mxu0 %v113_v13  ;;  %v157_v17 = vld [vmem:[%s2407_s5] sm:$0x3]  ;;  %s1916_s5 = smov 64   ;;  %243 = vmatpush.msra.mxu2 %v2061_v3 }
  0x1f   :  { %315 = vmatpush.msra.mxu3 %v2005_v8  ;;  %v2025_v18 = vperm.slane %v157_v17, 0  ;;  %v2032_v19 = vperm.slane %v157_v17, 1  ;;  %v2052_v42 = vld [vmem:[%s2405_s3] ss:$0 sm:$0xff]  ;;  %s1917_s3 = smov 96  }
  0x20   :  { %140 = vmatpush.msra.mxu0 %v112_v14  ;;  %244 = vmatpush.msra.mxu2 %v2063_v5 }
  0x21   :  { %472 = vmatpush.msrb.mxu3 %v1985_v0  ;;  %199 = vrot.lane.b32.xlu2 %v2025_v18, %s1915_s2 }
  0x22   :  { %141 = vmatpush.msra.mxu0 %v111_v15 }
  0x23   :  { %473 = vmatpush.msrb.mxu3 %v1998_v6  ;;  %1607 = vrot.lane.b32.xlu0 %v1606_v10, %s1915_s2  ;;  %v2067_v10 = vld [vmem:[#allocation10 + $0x8] sm:$0xff] }
  0x24   :  { %1617 = vrot.lane.b32.xlu1 %v1616_v11, %s1915_s2  ;;  %1545 = vmatmul.msk.f32.vlgmr.msra.gmra.mxu0 %vm119_vm0, %v109_v16  ;;  %v2072_v11 = vld [vmem:[#allocation10] sm:$0xff] }
  0x25   :  { %474 = vmatpush.msrb.mxu3 %v1989_v2  ;;  %492 = vmatpush.msrb.mxu0 %v1987_v1 }
  0x26   :  { %245 = vmatpush.msra.mxu2 %v2067_v10 }
  0x27   :  { %475 = vmatpush.msrb.mxu3 %v2005_v8  ;;  %493 = vmatpush.msrb.mxu0 %v2003_v7 }
  0x28   :  { %246 = vmatpush.msra.mxu2 %v2072_v11 }
  0x29   :  { %494 = vmatpush.msrb.mxu0 %v1993_v4  ;;  %201 = vrot.lane.b32.xlu2 %v2032_v19, %s1915_s2 }
  0x2a   :  { %1548 = vmatmul.msk.f32.vlgmr.msra.gmra.mxu2 %vm119_vm0, %v163_v36 }
  0x2b   :  { %495 = vmatpush.msrb.mxu0 %v2007_v9  ;;  %396 = vmatpush.msrb.mxu2 %v2061_v3 }
  0x2d   :  { %716 = vmatpush.msra.mxu0 %v2061_v3  ;;  %397 = vmatpush.msrb.mxu2 %v2063_v5 }
  0x2f   :  { %717 = vmatpush.msra.mxu0 %v2063_v5  ;;  %398 = vmatpush.msrb.mxu2 %v2067_v10 }
  0x31   :  { %718 = vmatpush.msra.mxu0 %v2067_v10  ;;  %399 = vmatpush.msrb.mxu2 %v2072_v11 }
  0x33   :  { %719 = vmatpush.msra.mxu0 %v2072_v11  ;;  %632 = vmatpush.msra.mxu2 %v1985_v0 }
  0x35   :  { %633 = vmatpush.msra.mxu2 %v1998_v6 }
  0x37   :  { %634 = vmatpush.msra.mxu2 %v1989_v2 }
  0x39   :  { %635 = vmatpush.msra.mxu2 %v2005_v8 }
  0x7b   :  { %v200_v37 = vpop.permute.xlu2 %199 }
  0x83   :  { %v202_v38 = vpop.permute.xlu2 %201 }
  0x84   :  { %v203_v39 = vsel %vm119_vm0, %v200_v37, %v202_v38 }
  0x8d   :  { %v1603_v20 = vpop.permute.xlu0 %1602 }
  0x8e   :  { %v1605_v21 = vunpack.i.h.bf16 %v1603_v20  ;;  %v1604_v22 = vunpack.i.l.bf16 %v1603_v20  ;;  %v1613_v23 = vpop.permute.xlu1 %1612 }
  0x8f   :  { %v1615_v26 = vunpack.i.h.bf16 %v1613_v23  ;;  %v1614_v27 = vunpack.i.l.bf16 %v1613_v23 }
  0x90   :  { %v194_v24 = vsel %vm119_vm0, %v1604_v22, %v1605_v21 }
  0x91   :  { %220 = vmatpush.msra.mxu1 %v194_v24  ;;  %v192_v34 = vsel %vm119_vm0, %v1614_v27, %v1615_v26 }
  0x95   :  { %v1608_v25 = vpop.permute.xlu0 %1607 }
  0x96   :  { %v1610_v28 = vunpack.i.h.bf16 %v1608_v25  ;;  %v1609_v29 = vunpack.i.l.bf16 %v1608_v25  ;;  %v1618_v30 = vpop.permute.xlu1 %1617 }
  0x97   :  { %v1620_v31 = vunpack.i.h.bf16 %v1618_v30  ;;  %v1619_v32 = vunpack.i.l.bf16 %v1618_v30 }
  0x98   :  { %v193_v33 = vsel %vm119_vm0, %v1609_v29, %v1610_v28 }
  0x99   :  { %221 = vmatpush.msra.mxu1 %v193_v33  ;;  %v191_v35 = vsel %vm119_vm0, %v1619_v32, %v1620_v31 }
  0x9b   :  { %222 = vmatpush.msra.mxu1 %v192_v34 }
  0x9d   :  { %223 = vmatpush.msra.mxu1 %v191_v35 }
  0x9e   :  { %1547 = vmatmul.msk.f32.vlgmr.msra.gmra.mxu1 %vm119_vm0, %v163_v36 }
  0x9f   :  { %332 = vmatpush.msrb.mxu1 %v1987_v1 }
  0xa1   :  { %333 = vmatpush.msrb.mxu1 %v2003_v7  ;;  %v143_v43 = vpop.f32.mrf.mxu0 }
  0xa2   :  { %v2055_v44 = vadd.f32 %v2052_v42, %v143_v43 }
  0xa3   :  { %334 = vmatpush.msrb.mxu1 %v1993_v4 }
  0xa5   :  { %335 = vmatpush.msrb.mxu1 %v2007_v9 }
  0xa7   :  { %556 = vmatpush.msra.mxu1 %v2061_v3 }
  0xa9   :  { %557 = vmatpush.msra.mxu1 %v2063_v5 }
  0xab   :  { %558 = vmatpush.msra.mxu1 %v2067_v10 }
  0xad   :  { %559 = vmatpush.msra.mxu1 %v2072_v11 }
 0x11b   :  { %v225_v40 = vpop.f32.mrf.mxu1 }
 0x11c   :  { %v226_v41 = vadd.f32 %v225_v40, %v203_v39 }
 0x11e   :  { %272 = vrot.lane.b32.xlu0 %v226_v41, %s1916_s5  ;;  %v251_v45 = vadd.f32 %v226_v41, %v2055_v44 }
 0x120   :  { %v1549_v46 = vmul.f32 -1.442695, %v251_v45 }
 0x122   :  { %1623 = vpow2.f32 %v1549_v46 }
 0x126   :  { %288 = vrot.lane.b32.xlu0 %v163_v36, %s1915_s2 }
 0x128   :  { %v1624_v47 = vpop.eup %1623 }
 0x129   :  { %v255_v48 = vadd.f32 1.0, %v1624_v47 }
 0x12b   :  { %1625 = vrcp.f32 %v255_v48  ;;  %v267_v54 = vand.u32 2147483648, %v255_v48  ;;  %vm261_vm2 = vweird.f32 %v255_v48  ;;  %v265_v55 = vand.u32 2147483647, %v255_v48 }
 0x12d   :  { %v268_v57 = vor.u32 1.1754944e-38, %v267_v54  ;;  %vm266_vm4 = vcmp.eq.f32.partialorder %v265_v55, 8.507059e+37 }
 0x131   :  { %v1626_v49 = vpop.eup %1625 }
 0x132   :  { %v257_v50 = vmul.f32 %v1626_v49, %v255_v48  ;;  %vm262_vm1 = vweird.f32 %v1626_v49 }
 0x133   :  { %vm263_vm3 = vmor %vm261_vm2, %vm262_vm1 }
 0x134   :  { %v258_v51 = vsub.f32 1.0, %v257_v50  ;;  %v2118_v50 = vld [vmem:[%s2409_s7] ss:$0 sm:$0xff] }
 0x136   :  { %v259_v52 = vmul.f32 %v1626_v49, %v258_v51  ;;  %v248_v51 = vpop.f32.mrf.mxu2 }
 0x138   :  { %v260_v53 = vadd.f32 %v1626_v49, %v259_v52  ;;  %v249_v52 = vadd.f32 %v2118_v50, %v248_v51 }
 0x13a   :  { %v264_v56 = vsel %vm263_vm3, %v1626_v49, %v260_v53 }
 0x13b   :  { %v269_v59 = vsel %vm266_vm4, %v268_v57, %v264_v56 }
 0x13c   :  { %v282_v13 = vsub.f32 1.0, %v269_v59 }
 0x190   :  { %v273_v58 = vpop.permute.xlu0 %272 }
 0x191   :  { %v275_v60 = vmul.f32 %v273_v58, %v269_v59 }
 0x193   :  { %277 = vrot.lane.b32.xlu1 %v275_v60, %s1916_s5 }
 0x198   :  { %v2090_v12 = vpop.permute.xlu0 %288 }
 0x199   :  { %v291_v15 = vmul.f32 %v2090_v12, %v269_v59 }
 0x205   :  { %v278_v61 = vpop.permute.xlu1 %277 }
 0x206   :  { %v280_v62 = vadd.f32 %v278_v61, %v2055_v44 }
 0x208   :  { %1627 = vtanh.f32 %v280_v62 }
 0x20e   :  { %v1628_v63 = vpop.eup %1627 }
 0x20f   :  { %284 = vrot.lane.b32.xlu2 %v1628_v63, %s1917_s3 }
 0x269   :  { %v285_v14 = vpop.permute.xlu2 %284 }
 0x26a   :  { %v287_v16 = vmul.f32 %v285_v14, %v282_v13 }
 0x26c   :  { %v292_v17 = vadd.f32 %v291_v15, %v287_v16 }
 0x26e   :  { %296 = vrot.lane.b32.xlu1 %v292_v17, %s1917_s3  ;;  %v450_v43 = vrot.slane %v292_v17, 6 }
 0x2e0   :  { %v297_v20 = vpop.permute.xlu1 %296 }
 0x2e1   :  { %1550 = vmatmul.msk.f32.vlgmr.msra.gmra.mxu3 %vm119_vm0, %v297_v20  ;;  %1551 = vmatmul.msk.f32.vlgmr.msrb.gmra.mxu1 %vm119_vm0, %v297_v20 }
 0x2e2   :  { %652 = vmatpush.msra.mxu3 %v1987_v1  ;;  %792 = vmatpush.msrb.mxu1 %v1985_v0 }
 0x2e4   :  { %653 = vmatpush.msra.mxu3 %v2003_v7  ;;  %793 = vmatpush.msrb.mxu1 %v1998_v6 }
 0x2e6   :  { %654 = vmatpush.msra.mxu3 %v1993_v4  ;;  %794 = vmatpush.msrb.mxu1 %v1989_v2 }
 0x2e8   :  { %655 = vmatpush.msra.mxu3 %v2007_v9  ;;  %795 = vmatpush.msrb.mxu1 %v2005_v8 }
 0x35e   :  { %v337_v21 = vpop.f32.mrf.mxu1 }
 0x35f   :  { %v338_v22 = vadd.f32 %v337_v21, %v2032_v19 }
 0x361   :  { %v407_v23 = vrot.slane %v338_v22, 6 }
 0x363   :  { %434 = vrot.lane.b32.xlu1 %v407_v23, %s1917_s3  ;;  %410 = vrot.lane.b32.xlu0 %v407_v23, %s1915_s2  ;;  %v110_v23 = vld [vmem:[#allocation2 + $0x8] sm:$0xff] }
 0x364   :  { %v317_v24 = vpop.f32.mrf.mxu3  ;;  %1546 = vmatmul.msk.f32.gmra.mxu0 %vm119_vm0, %v110_v23 }
 0x365   :  { %v2108_v25 = vadd.f32 %v317_v24, %v2025_v18 }
 0x367   :  { %v406_v26 = vrot.slane %v2108_v25, 6  ;;  %v340_v53 = vadd.f32 %v2108_v25, %v249_v52 }
 0x369   :  { %408 = vrot.lane.b32.xlu2 %v406_v26, %s1915_s2  ;;  %v1552_v54 = vmul.f32 -1.442695, %v340_v53 }
 0x3c3   :  { %v409_v27 = vpop.permute.xlu2 %408 }
 0x3d5   :  { %v411_v28 = vpop.permute.xlu0 %410  ;;  %v435_v46 = vpop.permute.xlu1 %434 }
 0x3d6   :  { %v412_v29 = vsel %vm119_vm0, %v409_v27, %v411_v28 }
 0x3d7   :  { %v414_v30 = vadd.f32 %v412_v29, %v2055_v44 }
 0x3d9   :  { %v1554_v31 = vmul.f32 -1.442695, %v414_v30 }
 0x3db   :  { %1629 = vpow2.f32 %v1554_v31 }
 0x3e1   :  { %v1630_v32 = vpop.eup %1629 }
 0x3e2   :  { %v418_v33 = vadd.f32 1.0, %v1630_v32 }
 0x3e4   :  { %1631 = vrcp.f32 %v418_v33  ;;  %v430_v37 = vand.u32 2147483648, %v418_v33  ;;  %v428_v39 = vand.u32 2147483647, %v418_v33  ;;  %vm424_vm6 = vweird.f32 %v418_v33 }
 0x3e5   :  { %1633 = vpow2.f32 %v1552_v54 }
 0x3e6   :  { %v431_v41 = vor.u32 1.1754944e-38, %v430_v37  ;;  %vm429_vm8 = vcmp.eq.f32.partialorder %v428_v39, 8.507059e+37 }
 0x3ea   :  { %v1632_v34 = vpop.eup %1631 }
 0x3eb   :  { %v420_v35 = vmul.f32 %v1632_v34, %v418_v33  ;;  %vm425_vm5 = vweird.f32 %v1632_v34  ;;  %v1634_v55 = vpop.eup %1633 }
 0x3ec   :  { %vm426_vm7 = vmor %vm424_vm6, %vm425_vm5  ;;  %v344_v56 = vadd.f32 1.0, %v1634_v55 }
 0x3ed   :  { %v421_v36 = vsub.f32 1.0, %v420_v35 }
 0x3ee   :  { %1635 = vrcp.f32 %v344_v56  ;;  %v356_v14 = vand.u32 2147483648, %v344_v56  ;;  %vm350_vm10 = vweird.f32 %v344_v56  ;;  %v354_v15 = vand.u32 2147483647, %v344_v56 }
 0x3ef   :  { %v422_v38 = vmul.f32 %v1632_v34, %v421_v36 }
 0x3f0   :  { %v357_v20 = vor.u32 1.1754944e-38, %v356_v14  ;;  %vm355_vm12 = vcmp.eq.f32.partialorder %v354_v15, 8.507059e+37 }
 0x3f1   :  { %v423_v40 = vadd.f32 %v1632_v34, %v422_v38 }
 0x3f3   :  { %v427_v45 = vsel %vm426_vm7, %v1632_v34, %v423_v40 }
 0x3f4   :  { %v432_v47 = vsel %vm429_vm8, %v431_v41, %v427_v45  ;;  %v1636_v57 = vpop.eup %1635 }
 0x3f5   :  { %v437_v48 = vmul.f32 %v435_v46, %v432_v47  ;;  %v452_v49 = vmul.f32 %v450_v43, %v432_v47  ;;  %v346_v58 = vmul.f32 %v1636_v57, %v344_v56  ;;  %vm351_vm9 = vweird.f32 %v1636_v57 }
 0x3f6   :  { %vm352_vm11 = vmor %vm350_vm10, %vm351_vm9  ;;  %v444_v24 = vsub.f32 1.0, %v432_v47 }
 0x3f7   :  { %439 = vrot.lane.b32.xlu2 %v437_v48, %s1916_s5  ;;  %v347_v60 = vsub.f32 1.0, %v346_v58 }
 0x3f9   :  { %v348_v62 = vmul.f32 %v1636_v57, %v347_v60 }
 0x3fb   :  { %v349_v63 = vadd.f32 %v1636_v57, %v348_v62 }
 0x3fd   :  { %v353_v16 = vsel %vm352_vm11, %v1636_v57, %v349_v63 }
 0x3fe   :  { %v358_v21 = vsel %vm355_vm12, %v357_v20, %v353_v16 }
 0x3ff   :  { %361 = vrot.lane.b32.xlu2 %v249_v52, %s1916_s5  ;;  %v371_v41 = vsub.f32 1.0, %v358_v21  ;;  %v377_v45 = vmul.f32 %v358_v21, %v2090_v12 }
 0x451   :  { %v440_v59 = vpop.permute.xlu2 %439 }
 0x452   :  { %v442_v61 = vadd.f32 %v440_v59, %v2055_v44 }
 0x454   :  { %1637 = vtanh.f32 %v442_v61 }
 0x459   :  { %v362_v17 = vpop.permute.xlu2 %361 }
 0x45a   :  { %v1638_v13 = vpop.eup %1637  ;;  %v364_v22 = vmul.f32 %v362_v17, %v358_v21 }
 0x45b   :  { %446 = vrot.lane.b32.xlu0 %v1638_v13, %s1917_s3 }
 0x463   :  { %366 = vrot.lane.b32.xlu0 %v364_v22, %s1916_s5 }
 0x4cd   :  { %v447_v26 = vpop.permute.xlu0 %446 }
 0x4ce   :  { %v449_v27 = vmul.f32 %v447_v26, %v444_v24 }
 0x4d0   :  { %v2127_v28 = vadd.f32 %v452_v49, %v449_v27 }
 0x4d2   :  { %v455_v29 = vrot.slane %v2127_v28, 2  ;;  %v610_v63 = vrot.slane %v2127_v28, 6 }
 0x4d4   :  { %456 = vrot.lane.b32.xlu1 %v455_v29, %s1917_s3 }
 0x4d5   :  { %v367_v30 = vpop.permute.xlu0 %366 }
 0x4d6   :  { %v369_v31 = vadd.f32 %v367_v30, %v2108_v25  ;;  %v2143_v25 = vpop.f32.mrf.mxu0 }
 0x4d8   :  { %1639 = vtanh.f32 %v369_v31 }
 0x4de   :  { %v1640_v32 = vpop.eup %1639 }
 0x4df   :  { %373 = vrot.lane.b32.xlu1 %v1640_v32, %s1917_s3 }
 0x546   :  { %v457_v33 = vpop.permute.xlu1 %456 }
 0x547   :  { %1555 = vmatmul.msk.f32.vlgmr.msrb.gmra.mxu3 %vm119_vm0, %v457_v33  ;;  %1556 = vmatmul.msk.f32.vlgmr.msrb.gmra.mxu0 %vm119_vm0, %v457_v33 }
 0x548   :  { %948 = vmatpush.msrb.mxu0 %v1985_v0  ;;  %876 = vmatpush.msrb.mxu3 %v2061_v3 }
 0x54a   :  { %949 = vmatpush.msrb.mxu0 %v1998_v6  ;;  %877 = vmatpush.msrb.mxu3 %v2063_v5 }
 0x54c   :  { %950 = vmatpush.msrb.mxu0 %v1989_v2  ;;  %878 = vmatpush.msrb.mxu3 %v2067_v10 }
 0x54e   :  { %951 = vmatpush.msrb.mxu0 %v2005_v8  ;;  %879 = vmatpush.msrb.mxu3 %v2072_v11 }
 0x551   :  { %v374_v40 = vpop.permute.xlu1 %373 }
 0x552   :  { %v376_v43 = vmul.f32 %v374_v40, %v371_v41 }
 0x554   :  { %v2154_v46 = vadd.f32 %v377_v45, %v376_v43 }
 0x5c4   :  { %v497_v34 = vpop.f32.mrf.mxu0 }
 0x5c5   :  { %v498_v35 = vadd.f32 %v497_v34, %v2032_v19 }
 0x5c7   :  { %v567_v36 = vrot.slane %v498_v35, 4 }
 0x5c9   :  { %594 = vrot.lane.b32.xlu1 %v567_v36, %s1917_s3  ;;  %570 = vrot.lane.b32.xlu0 %v567_v36, %s1915_s2 }
 0x5ca   :  { %v477_v37 = vpop.f32.mrf.mxu3 }
 0x5cb   :  { %v2149_v38 = vadd.f32 %v477_v37, %v2025_v18 }
 0x5cd   :  { %v566_v39 = vrot.slane %v2149_v38, 4 }
 0x5cf   :  { %568 = vrot.lane.b32.xlu2 %v566_v39, %s1915_s2 }
 0x5d7   :  { %380 = vrot.lane.b32.xlu2 %v2154_v46, %s1917_s3 }
 0x629   :  { %v569_v47 = vpop.permute.xlu2 %568 }
 0x631   :  { %v2158_v48 = vpop.permute.xlu2 %380 }
 0x632   :  { %1553 = vmatmul.msk.f32.vlgmr.msrb.gmra.mxu2 %vm119_vm0, %v2158_v48 }
 0x633   :  { %812 = vmatpush.msrb.mxu2 %v1987_v1 }
 0x635   :  { %813 = vmatpush.msrb.mxu2 %v2003_v7 }
 0x637   :  { %814 = vmatpush.msrb.mxu2 %v1993_v4 }
 0x639   :  { %815 = vmatpush.msrb.mxu2 %v2007_v9 }
 0x63b   :  { %v571_v12 = vpop.permute.xlu0 %570  ;;  %v595_v15 = vpop.permute.xlu1 %594 }
 0x63c   :  { %v572_v49 = vsel %vm119_vm0, %v569_v47, %v571_v12 }
 0x63d   :  { %v574_v51 = vadd.f32 %v572_v49, %v2055_v44 }
 0x63f   :  { %v1559_v52 = vmul.f32 -1.442695, %v574_v51 }
 0x641   :  { %1641 = vpow2.f32 %v1559_v52 }
 0x647   :  { %v1642_v53 = vpop.eup %1641 }
 0x648   :  { %v578_v54 = vadd.f32 1.0, %v1642_v53 }
 0x64a   :  { %1643 = vrcp.f32 %v578_v54  ;;  %v590_v58 = vand.u32 2147483648, %v578_v54  ;;  %v588_v60 = vand.u32 2147483647, %v578_v54  ;;  %vm584_vm14 = vweird.f32 %v578_v54 }
 0x64c   :  { %v591_v62 = vor.u32 1.1754944e-38, %v590_v58  ;;  %vm589_vm1 = vcmp.eq.f32.partialorder %v588_v60, 8.507059e+37 }
 0x650   :  { %v1644_v55 = vpop.eup %1643 }
 0x651   :  { %v580_v56 = vmul.f32 %v1644_v55, %v578_v54  ;;  %vm585_vm13 = vweird.f32 %v1644_v55 }
 0x652   :  { %vm586_vm15 = vmor %vm584_vm14, %vm585_vm13 }
 0x653   :  { %v581_v57 = vsub.f32 1.0, %v580_v56 }
 0x655   :  { %v582_v59 = vmul.f32 %v1644_v55, %v581_v57 }
 0x657   :  { %v583_v61 = vadd.f32 %v1644_v55, %v582_v59 }
 0x659   :  { %v587_v13 = vsel %vm586_vm15, %v1644_v55, %v583_v61 }
 0x65a   :  { %v592_v14 = vsel %vm589_vm1, %v591_v62, %v587_v13 }
 0x65b   :  { %v597_v16 = vmul.f32 %v595_v15, %v592_v14  ;;  %v612_v17 = vmul.f32 %v610_v63, %v592_v14  ;;  %v604_v45 = vsub.f32 1.0, %v592_v14 }
 0x65d   :  { %599 = vrot.lane.b32.xlu0 %v597_v16, %s1916_s5 }
 0x6b5   :  { %v401_v20 = vpop.f32.mrf.mxu2 }
 0x6b6   :  { %v402_v21 = vadd.f32 %v2118_v50, %v401_v20 }
 0x6b8   :  { %521 = vrot.lane.b32.xlu0 %v402_v21, %s1916_s5  ;;  %v500_v26 = vadd.f32 %v2149_v38, %v402_v21 }
 0x6ba   :  { %v1557_v27 = vmul.f32 -1.442695, %v500_v26 }
 0x6cf   :  { %v600_v22 = vpop.permute.xlu0 %599 }
 0x6d0   :  { %v602_v23 = vadd.f32 %v600_v22, %v2055_v44 }
 0x6d2   :  { %1645 = vtanh.f32 %v602_v23 }
 0x6d3   :  { %1647 = vpow2.f32 %v1557_v27 }
 0x6d8   :  { %v1646_v24 = vpop.eup %1645 }
 0x6d9   :  { %606 = vrot.lane.b32.xlu1 %v1646_v24, %s1917_s3  ;;  %v1648_v28 = vpop.eup %1647 }
 0x6da   :  { %v504_v29 = vadd.f32 1.0, %v1648_v28 }
 0x6dc   :  { %1649 = vrcp.f32 %v504_v29  ;;  %v516_v35 = vand.u32 2147483648, %v504_v29  ;;  %vm510_vm3 = vweird.f32 %v504_v29  ;;  %v514_v36 = vand.u32 2147483647, %v504_v29 }
 0x6de   :  { %v517_v39 = vor.u32 1.1754944e-38, %v516_v35  ;;  %vm515_vm5 = vcmp.eq.f32.partialorder %v514_v36, 8.507059e+37 }
 0x6e2   :  { %v1650_v30 = vpop.eup %1649 }
 0x6e3   :  { %v506_v31 = vmul.f32 %v1650_v30, %v504_v29  ;;  %vm511_vm2 = vweird.f32 %v1650_v30 }
 0x6e4   :  { %vm512_vm4 = vmor %vm510_vm3, %vm511_vm2 }
 0x6e5   :  { %v507_v32 = vsub.f32 1.0, %v506_v31 }
 0x6e7   :  { %v508_v33 = vmul.f32 %v1650_v30, %v507_v32 }
 0x6e9   :  { %v509_v34 = vadd.f32 %v1650_v30, %v508_v33 }
 0x6eb   :  { %v513_v37 = vsel %vm512_vm4, %v1650_v30, %v509_v34 }
 0x6ec   :  { %v518_v40 = vsel %vm515_vm5, %v517_v39, %v513_v37 }
 0x6ed   :  { %v537_v57 = vmul.f32 %v518_v40, %v2154_v46 }
 0x72a   :  { %v522_v41 = vpop.permute.xlu0 %521 }
 0x72b   :  { %v524_v43 = vmul.f32 %v522_v41, %v518_v40 }
 0x72d   :  { %526 = vrot.lane.b32.xlu1 %v524_v43, %s1916_s5 }
 0x74b   :  { %v607_v47 = vpop.permute.xlu1 %606 }
 0x74c   :  { %v609_v12 = vmul.f32 %v607_v47, %v604_v45 }
 0x74e   :  { %v2176_v49 = vadd.f32 %v612_v17, %v609_v12 }
 0x750   :  { %v615_v51 = vrot.slane %v2176_v49, 4  ;;  %v770_v33 = vrot.slane %v2176_v49, 6 }
 0x752   :  { %616 = vrot.lane.b32.xlu2 %v615_v51, %s1917_s3 }
 0x79f   :  { %v527_v52 = vpop.permute.xlu1 %526 }
 0x7a0   :  { %v529_v53 = vadd.f32 %v527_v52, %v2149_v38  ;;  %v531_v38 = vsub.f32 1.0, %v518_v40 }
 0x7a2   :  { %1651 = vtanh.f32 %v529_v53 }
 0x7a8   :  { %v1652_v54 = vpop.eup %1651 }
 0x7a9   :  { %533 = vrot.lane.b32.xlu2 %v1652_v54, %s1917_s3 }
 0x7ac   :  { %v617_v55 = vpop.permute.xlu2 %616 }
 0x7ad   :  { %1560 = vmatmul.msk.f32.vlgmr.msra.gmra.mxu2 %vm119_vm0, %v617_v55  ;;  %1561 = vmatmul.msk.f32.vlgmr.msra.gmra.mxu3 %vm119_vm0, %v617_v55 }
 0x7ae   :  { %1108 = vmatpush.msra.mxu3 %v1985_v0  ;;  %1032 = vmatpush.msra.mxu2 %v2061_v3 }
 0x7b0   :  { %1109 = vmatpush.msra.mxu3 %v1998_v6  ;;  %1033 = vmatpush.msra.mxu2 %v2063_v5 }
 0x7b2   :  { %1110 = vmatpush.msra.mxu3 %v1989_v2  ;;  %1034 = vmatpush.msra.mxu2 %v2067_v10 }
 0x7b4   :  { %1111 = vmatpush.msra.mxu3 %v2005_v8  ;;  %1035 = vmatpush.msra.mxu2 %v2072_v11 }
 0x803   :  { %v534_v56 = vpop.permute.xlu2 %533 }
 0x804   :  { %v536_v58 = vmul.f32 %v534_v56, %v531_v38 }
 0x806   :  { %v2193_v59 = vadd.f32 %v537_v57, %v536_v58 }
 0x808   :  { %540 = vrot.lane.b32.xlu0 %v2193_v59, %s1917_s3 }
 0x830   :  { %v637_v60 = vpop.f32.mrf.mxu2  ;;  %v657_v61 = vpop.f32.mrf.mxu3 }
 0x831   :  { %v2198_v62 = vadd.f32 %v637_v60, %v2025_v18  ;;  %v658_v63 = vadd.f32 %v657_v61, %v2032_v19 }
 0x833   :  { %v727_v13 = vrot.slane %v658_v63, 2  ;;  %v726_v14 = vrot.slane %v2198_v62, 2 }
 0x835   :  { %728 = vrot.lane.b32.xlu1 %v726_v14, %s1915_s2  ;;  %730 = vrot.lane.b32.xlu2 %v727_v13, %s1915_s2 }
 0x836   :  { %754 = vrot.lane.b32.xlu0 %v727_v13, %s1917_s3 }
 0x87a   :  { %v541_v46 = vpop.permute.xlu0 %540 }
 0x87b   :  { %1558 = vmatmul.msk.f32.vlgmr.msra.gmra.mxu1 %vm119_vm0, %v541_v46 }
 0x87c   :  { %968 = vmatpush.msra.mxu1 %v1987_v1 }
 0x87e   :  { %969 = vmatpush.msra.mxu1 %v2003_v7 }
 0x880   :  { %970 = vmatpush.msra.mxu1 %v1993_v4 }
 0x882   :  { %971 = vmatpush.msra.mxu1 %v2007_v9 }
 0x88f   :  { %v731_v15 = vpop.permute.xlu2 %730 }
 0x8a7   :  { %v729_v16 = vpop.permute.xlu1 %728 }
 0x8a8   :  { %v732_v17 = vsel %vm119_vm0, %v729_v16, %v731_v15  ;;  %v755_v35 = vpop.permute.xlu0 %754 }
 0x8a9   :  { %v734_v20 = vadd.f32 %v732_v17, %v2055_v44 }
 0x8ab   :  { %v1564_v21 = vmul.f32 -1.442695, %v734_v20 }
 0x8ad   :  { %1653 = vpow2.f32 %v1564_v21 }
 0x8b3   :  { %v1654_v22 = vpop.eup %1653 }
 0x8b4   :  { %v738_v23 = vadd.f32 1.0, %v1654_v22 }
 0x8b6   :  { %1655 = vrcp.f32 %v738_v23  ;;  %v750_v28 = vand.u32 2147483648, %v738_v23  ;;  %v748_v30 = vand.u32 2147483647, %v738_v23  ;;  %vm744_vm7 = vweird.f32 %v738_v23 }
 0x8b8   :  { %v751_v32 = vor.u32 1.1754944e-38, %v750_v28  ;;  %vm749_vm9 = vcmp.eq.f32.partialorder %v748_v30, 8.507059e+37  ;;  %v2258_v30 = vadd.f32 %v2052_v42, %v2143_v25 }
 0x8bc   :  { %v1656_v24 = vpop.eup %1655 }
 0x8bd   :  { %v740_v26 = vmul.f32 %v1656_v24, %v738_v23  ;;  %vm745_vm6 = vweird.f32 %v1656_v24 }
 0x8be   :  { %vm746_vm8 = vmor %vm744_vm7, %vm745_vm6 }
 0x8bf   :  { %v741_v27 = vsub.f32 1.0, %v740_v26 }
 0x8c1   :  { %v742_v29 = vmul.f32 %v1656_v24, %v741_v27 }
 0x8c3   :  { %v743_v31 = vadd.f32 %v1656_v24, %v742_v29 }
 0x8c5   :  { %v747_v34 = vsel %vm746_vm8, %v1656_v24, %v743_v31 }
 0x8c6   :  { %v752_v36 = vsel %vm749_vm9, %v751_v32, %v747_v34 }
 0x8c7   :  { %v757_v37 = vmul.f32 %v755_v35, %v752_v36  ;;  %v772_v39 = vmul.f32 %v770_v33, %v752_v36  ;;  %v764_v14 = vsub.f32 1.0, %v752_v36 }
 0x8c9   :  { %759 = vrot.lane.b32.xlu1 %v757_v37, %s1916_s5 }
 0x8f8   :  { %v561_v40 = vpop.f32.mrf.mxu1 }
 0x8f9   :  { %v562_v41 = vadd.f32 %v2118_v50, %v561_v40 }
 0x8fb   :  { %681 = vrot.lane.b32.xlu1 %v562_v41, %s1916_s5  ;;  %v660_v45 = vadd.f32 %v2198_v62, %v562_v41 }
 0x8fd   :  { %v1562_v12 = vmul.f32 -1.442695, %v660_v45 }
 0x93b   :  { %v760_v43 = vpop.permute.xlu1 %759 }
 0x93c   :  { %v762_v47 = vadd.f32 %v760_v43, %v2055_v44 }
 0x93e   :  { %1657 = vtanh.f32 %v762_v47 }
 0x93f   :  { %1659 = vpow2.f32 %v1562_v12 }
 0x944   :  { %v1658_v49 = vpop.eup %1657 }
 0x945   :  { %766 = vrot.lane.b32.xlu2 %v1658_v49, %s1917_s3  ;;  %v1660_v51 = vpop.eup %1659 }
 0x946   :  { %v664_v52 = vadd.f32 1.0, %v1660_v51 }
 0x948   :  { %1661 = vrcp.f32 %v664_v52  ;;  %v676_v57 = vand.u32 2147483648, %v664_v52  ;;  %vm670_vm11 = vweird.f32 %v664_v52  ;;  %v674_v58 = vand.u32 2147483647, %v664_v52 }
 0x94a   :  { %v677_v60 = vor.u32 1.1754944e-38, %v676_v57  ;;  %vm675_vm13 = vcmp.eq.f32.partialorder %v674_v58, 8.507059e+37 }
 0x94e   :  { %v1662_v53 = vpop.eup %1661 }
 0x94f   :  { %v666_v54 = vmul.f32 %v1662_v53, %v664_v52  ;;  %vm671_vm10 = vweird.f32 %v1662_v53 }
 0x950   :  { %vm672_vm12 = vmor %vm670_vm11, %vm671_vm10 }
 0x951   :  { %v667_v55 = vsub.f32 1.0, %v666_v54 }
 0x953   :  { %v668_v38 = vmul.f32 %v1662_v53, %v667_v55 }
 0x955   :  { %v669_v56 = vadd.f32 %v1662_v53, %v668_v38 }
 0x957   :  { %v673_v44 = vsel %vm672_vm12, %v1662_v53, %v669_v56 }
 0x958   :  { %v678_v61 = vsel %vm675_vm13, %v677_v60, %v673_v44 }
 0x959   :  { %v697_v26 = vmul.f32 %v678_v61, %v2193_v59 }
 0x96d   :  { %v682_v63 = vpop.permute.xlu1 %681 }
 0x96e   :  { %v684_v13 = vmul.f32 %v682_v63, %v678_v61 }
 0x970   :  { %686 = vrot.lane.b32.xlu2 %v684_v13, %s1916_s5 }
 0x99f   :  { %v767_v46 = vpop.permute.xlu2 %766 }
 0x9a0   :  { %v769_v15 = vmul.f32 %v767_v46, %v764_v14 }
 0x9a2   :  { %v2220_v16 = vadd.f32 %v772_v39, %v769_v15 }
 0x9a4   :  { %v775_v17 = vrot.slane %v2220_v16, 6  ;;  %v1719_v16 = vld [vmem:[#allocation8 + $0x30] sm:$0xff] }
 0x9a6   :  { %776 = vrot.lane.b32.xlu0 %v775_v17, %s1917_s3 }
 0x9ca   :  { %v687_v20 = vpop.permute.xlu2 %686 }
 0x9cb   :  { %v689_v21 = vadd.f32 %v687_v20, %v2198_v62  ;;  %v691_v62 = vsub.f32 1.0, %v678_v61 }
 0x9cd   :  { %1663 = vtanh.f32 %v689_v21 }
 0x9d3   :  { %v1664_v22 = vpop.eup %1663 }
 0x9d4   :  { %693 = vrot.lane.b32.xlu0 %v1664_v22, %s1917_s3 }
 0xa18   :  { %v777_v23 = vpop.permute.xlu0 %776 }
 0xa19   :  { %1565 = vmatmul.msk.f32.vlgmr.msrb.gmra.mxu1 %vm119_vm0, %v777_v23  ;;  %1566 = vmatmul.msk.f32.vlgmr.msrb.gmra.mxu2 %vm119_vm0, %v777_v23 }
 0xa1a   :  { %1268 = vmatpush.msrb.mxu2 %v1985_v0  ;;  %1192 = vmatpush.msrb.mxu1 %v2061_v3 }
 0xa1c   :  { %1269 = vmatpush.msrb.mxu2 %v1998_v6  ;;  %1193 = vmatpush.msrb.mxu1 %v2063_v5 }
 0xa1e   :  { %1270 = vmatpush.msrb.mxu2 %v1989_v2  ;;  %1194 = vmatpush.msrb.mxu1 %v2067_v10 }
 0xa20   :  { %1271 = vmatpush.msrb.mxu2 %v2005_v8  ;;  %1195 = vmatpush.msrb.mxu1 %v2072_v11 }
 0xa46   :  { %v694_v24 = vpop.permute.xlu0 %693 }
 0xa47   :  { %v696_v27 = vmul.f32 %v694_v24, %v691_v62 }
 0xa49   :  { %v2239_v0 = vadd.f32 %v697_v26, %v696_v27 }
 0xa4b   :  { %700 = vrot.lane.b32.xlu1 %v2239_v0, %s1917_s3 }
 0xa96   :  { %v797_v6 = vpop.f32.mrf.mxu1 }
 0xa97   :  { %v2244_v28 = vadd.f32 %v797_v6, %v2025_v18 }
 0xa99   :  { %886 = vrot.lane.b32.xlu2 %v2244_v28, %s1915_s2 }
 0xa9c   :  { %v817_v2 = vpop.f32.mrf.mxu2 }
 0xa9d   :  { %v818_v8 = vadd.f32 %v817_v2, %v2032_v19 }
 0xa9f   :  { %888 = vrot.lane.b32.xlu0 %v818_v8, %s1915_s2  ;;  %912 = vrot.lane.b32.xlu1 %v818_v8, %s1917_s3 }
 0xabd   :  { %v701_v29 = vpop.permute.xlu1 %700 }
 0xabe   :  { %1563 = vmatmul.msk.f32.vlgmr.msra.gmra.mxu0 %vm119_vm0, %v701_v29  ;;  %v1721_v29 = vld [vmem:[#allocation8 + $0x10] sm:$0xff] }
 0xabf   :  { %1128 = vmatpush.msra.mxu0 %v1987_v1 }
 0xac1   :  { %1129 = vmatpush.msra.mxu0 %v2003_v7 }
 0xac3   :  { %1130 = vmatpush.msra.mxu0 %v1993_v4 }
 0xac5   :  { %1131 = vmatpush.msra.mxu0 %v2007_v9 }
 0xaf3   :  { %v887_v31 = vpop.permute.xlu2 %886 }
 0xb11   :  { %v889_v32 = vpop.permute.xlu0 %888  ;;  %v913_v43 = vpop.permute.xlu1 %912 }
 0xb12   :  { %v890_v33 = vsel %vm119_vm0, %v887_v31, %v889_v32 }
 0xb13   :  { %v892_v34 = vadd.f32 %v890_v33, %v2258_v30 }
 0xb15   :  { %v1569_v35 = vmul.f32 -1.442695, %v892_v34 }
 0xb17   :  { %1665 = vpow2.f32 %v1569_v35 }
 0xb1d   :  { %v1666_v36 = vpop.eup %1665 }
 0xb1e   :  { %v896_v1 = vadd.f32 1.0, %v1666_v36 }
 0xb20   :  { %1667 = vrcp.f32 %v896_v1  ;;  %v908_v39 = vand.u32 2147483648, %v896_v1  ;;  %v906_v40 = vand.u32 2147483647, %v896_v1  ;;  %vm902_vm15 = vweird.f32 %v896_v1 }
 0xb22   :  { %v909_v25 = vor.u32 1.1754944e-38, %v908_v39  ;;  %vm907_vm2 = vcmp.eq.f32.partialorder %v906_v40, 8.507059e+37  ;;  %v1725_v39 = vld [vmem:[#allocation8 + $0x18] sm:$0xff] }
 0xb26   :  { %v1668_v7 = vpop.eup %1667 }
 0xb27   :  { %v898_v37 = vmul.f32 %v1668_v7, %v896_v1  ;;  %vm903_vm14 = vweird.f32 %v1668_v7 }
 0xb28   :  { %vm904_vm1 = vmor %vm902_vm15, %vm903_vm14 }
 0xb29   :  { %v899_v4 = vsub.f32 1.0, %v898_v37  ;;  %v1723_v37 = vld [vmem:[#allocation8 + $0x38] sm:$0xff] }
 0xb2b   :  { %v900_v9 = vmul.f32 %v1668_v7, %v899_v4  ;;  %v1724_v4 = vld [vmem:[#allocation8 + $0x28] sm:$0xff] }
 0xb2d   :  { %v901_v42 = vadd.f32 %v1668_v7, %v900_v9  ;;  %v1726_v9 = vld [vmem:[#allocation8 + $0x8] sm:$0xff] }
 0xb2f   :  { %v905_v41 = vsel %vm904_vm1, %v1668_v7, %v901_v42 }
 0xb30   :  { %v910_v45 = vsel %vm907_vm2, %v909_v25, %v905_v41 }
 0xb31   :  { %v915_v47 = vmul.f32 %v913_v43, %v910_v45  ;;  %v922_v22 = vsub.f32 1.0, %v910_v45  ;;  %v929_v62 = vmul.f32 %v910_v45, %v775_v17  ;;  %v1720_v17 = vld [vmem:[#allocation8 + $0x20] sm:$0xff] }
 0xb33   :  { %917 = vrot.lane.b32.xlu2 %v915_v47, %s1916_s5 }
 0xb3b   :  { %v721_v12 = vpop.f32.mrf.mxu0 }
 0xb3c   :  { %v722_v49 = vadd.f32 %v2118_v50, %v721_v12 }
 0xb3e   :  { %841 = vrot.lane.b32.xlu1 %v722_v49, %s1916_s5  ;;  %v820_v51 = vadd.f32 %v2244_v28, %v722_v49 }
 0xb40   :  { %v1567_v52 = vmul.f32 -1.442695, %v820_v51 }
 0xb42   :  { %1669 = vpow2.f32 %v1567_v52 }
 0xb48   :  { %v1670_v53 = vpop.eup %1669 }
 0xb49   :  { %v824_v38 = vadd.f32 1.0, %v1670_v53 }
 0xb4b   :  { %v836_v63 = vand.u32 2147483648, %v824_v38  ;;  %vm830_vm4 = vweird.f32 %v824_v38  ;;  %v834_v13 = vand.u32 2147483647, %v824_v38 }
 0xb4d   :  { %v837_v46 = vor.u32 1.1754944e-38, %v836_v63  ;;  %vm835_vm6 = vcmp.eq.f32.partialorder %v834_v13, 8.507059e+37 }
 0xb8d   :  { %v918_v54 = vpop.permute.xlu2 %917 }
 0xb8e   :  { %v920_v55 = vadd.f32 %v918_v54, %v2258_v30 }
 0xb90   :  { %1671 = vtanh.f32 %v920_v55 }
 0xb91   :  { %1673 = vrcp.f32 %v824_v38 }
 0xb96   :  { %v1672_v56 = vpop.eup %1671 }
 0xb97   :  { %924 = vrot.lane.b32.xlu0 %v1672_v56, %s1917_s3  ;;  %v1674_v57 = vpop.eup %1673 }
 0xb98   :  { %v826_v58 = vmul.f32 %v1674_v57, %v824_v38  ;;  %vm831_vm3 = vweird.f32 %v1674_v57 }
 0xb99   :  { %vm832_vm5 = vmor %vm830_vm4, %vm831_vm3 }
 0xb9a   :  { %v827_v44 = vsub.f32 1.0, %v826_v58 }
 0xb9c   :  { %v828_v60 = vmul.f32 %v1674_v57, %v827_v44 }
 0xb9e   :  { %v829_v61 = vadd.f32 %v1674_v57, %v828_v60 }
 0xba0   :  { %v833_v14 = vsel %vm832_vm5, %v1674_v57, %v829_v61 }
 0xba1   :  { %v838_v15 = vsel %vm835_vm6, %v837_v46, %v833_v14 }
 0xba2   :  { %v851_v31 = vsub.f32 1.0, %v838_v15  ;;  %v857_v33 = vmul.f32 %v838_v15, %v2239_v0 }
 0xbb0   :  { %v842_v20 = vpop.permute.xlu1 %841 }
 0xbb1   :  { %v844_v21 = vmul.f32 %v842_v20, %v838_v15 }
 0xbb3   :  { %846 = vrot.lane.b32.xlu0 %v844_v21, %s1916_s5 }
 0xc09   :  { %v925_v23 = vpop.permute.xlu0 %924 }
 0xc0a   :  { %v927_v24 = vmul.f32 %v925_v23, %v922_v22 }
 0xc0c   :  { %v2271_v26 = vadd.f32 %v929_v62, %v927_v24 }
 0xc0e   :  { %932 = vrot.lane.b32.xlu2 %v2271_v26, %s1917_s3  ;;  %v1086_v56 = vrot.slane %v2271_v26, 6 }
 0xc25   :  { %v847_v27 = vpop.permute.xlu0 %846 }
 0xc26   :  { %v849_v6 = vadd.f32 %v847_v27, %v2244_v28  ;;  %v1722_v28 = vld [vmem:[#allocation8] sm:$0xff] }
 0xc28   :  { %1675 = vtanh.f32 %v849_v6 }
 0xc2e   :  { %v1676_v2 = vpop.eup %1675 }
 0xc2f   :  { %853 = vrot.lane.b32.xlu1 %v1676_v2, %s1917_s3 }
 0xc68   :  { %v933_v8 = vpop.permute.xlu2 %932 }
 0xc69   :  { %1570 = vmatmul.msk.f32.vlgmr.msrb.gmra.mxu0 %vm119_vm0, %v933_v8  ;;  %1571 = vmatmul.msk.f32.vlgmr.msra.gmra.mxu1 %vm119_vm0, %v933_v8 }
 0xc6a   :  { %1428 = vmatpush.msra.mxu1 %v1719_v16  ;;  %1352 = vmatpush.msrb.mxu0 %v2061_v3 }
 0xc6c   :  { %1429 = vmatpush.msra.mxu1 %v1720_v17  ;;  %1353 = vmatpush.msrb.mxu0 %v2063_v5 }
 0xc6e   :  { %1430 = vmatpush.msra.mxu1 %v1721_v29  ;;  %1354 = vmatpush.msrb.mxu0 %v2067_v10 }
 0xc70   :  { %1431 = vmatpush.msra.mxu1 %v1722_v28  ;;  %1355 = vmatpush.msrb.mxu0 %v2072_v11 }
 0xca1   :  { %v854_v32 = vpop.permute.xlu1 %853 }
 0xca2   :  { %v856_v34 = vmul.f32 %v854_v32, %v851_v31 }
 0xca4   :  { %v2284_v35 = vadd.f32 %v857_v33, %v856_v34 }
 0xca6   :  { %860 = vrot.lane.b32.xlu2 %v2284_v35, %s1917_s3 }
 0xce6   :  { %v953_v3 = vpop.f32.mrf.mxu0  ;;  %v973_v5 = vpop.f32.mrf.mxu1 }
 0xce7   :  { %v2289_v36 = vadd.f32 %v953_v3, %v2025_v18  ;;  %v974_v10 = vadd.f32 %v973_v5, %v2032_v19 }
 0xce9   :  { %v1043_v1 = vrot.slane %v974_v10, 6  ;;  %v1042_v11 = vrot.slane %v2289_v36, 6 }
 0xceb   :  { %1044 = vrot.lane.b32.xlu0 %v1042_v11, %s1915_s2  ;;  %1046 = vrot.lane.b32.xlu1 %v1043_v1, %s1915_s2 }
 0xcec   :  { %1070 = vrot.lane.b32.xlu2 %v1043_v1, %s1917_s3 }
 0xd00   :  { %v861_v7 = vpop.permute.xlu2 %860 }
 0xd01   :  { %1568 = vmatmul.msk.f32.vlgmr.msrb.gmra.mxu3 %vm119_vm0, %v861_v7 }
 0xd02   :  { %1288 = vmatpush.msrb.mxu3 %v1723_v37 }
 0xd04   :  { %1289 = vmatpush.msrb.mxu3 %v1724_v4 }
 0xd06   :  { %1290 = vmatpush.msrb.mxu3 %v1725_v39 }
 0xd08   :  { %1291 = vmatpush.msrb.mxu3 %v1726_v9 }
 0xd46   :  { %v1071_v58 = vpop.permute.xlu2 %1070 }
 0xd5d   :  { %v1047_v40 = vpop.permute.xlu1 %1046  ;;  %v1045_v42 = vpop.permute.xlu0 %1044 }
 0xd5e   :  { %v1048_v25 = vsel %vm119_vm0, %v1045_v42, %v1047_v40 }
 0xd5f   :  { %v1050_v41 = vadd.f32 %v1048_v25, %v2258_v30 }
 0xd61   :  { %v1574_v43 = vmul.f32 -1.442695, %v1050_v41 }
 0xd63   :  { %1677 = vpow2.f32 %v1574_v43 }
 0xd69   :  { %v1678_v45 = vpop.eup %1677 }
 0xd6a   :  { %v1054_v47 = vadd.f32 1.0, %v1678_v45 }
 0xd6c   :  { %1679 = vrcp.f32 %v1054_v47  ;;  %v1066_v52 = vand.u32 2147483648, %v1054_v47  ;;  %v1064_v54 = vand.u32 2147483647, %v1054_v47  ;;  %vm1060_vm8 = vweird.f32 %v1054_v47 }
 0xd6e   :  { %v1067_v38 = vor.u32 1.1754944e-38, %v1066_v52  ;;  %vm1065_vm10 = vcmp.eq.f32.partialorder %v1064_v54, 8.507059e+37 }
 0xd72   :  { %v1680_v12 = vpop.eup %1679 }
 0xd73   :  { %v1056_v49 = vmul.f32 %v1680_v12, %v1054_v47  ;;  %vm1061_vm7 = vweird.f32 %v1680_v12 }
 0xd74   :  { %vm1062_vm9 = vmor %vm1060_vm8, %vm1061_vm7 }
 0xd75   :  { %v1057_v51 = vsub.f32 1.0, %v1056_v49 }
 0xd77   :  { %v1058_v53 = vmul.f32 %v1680_v12, %v1057_v51 }
 0xd79   :  { %v1059_v55 = vadd.f32 %v1680_v12, %v1058_v53 }
 0xd7b   :  { %v1063_v57 = vsel %vm1062_vm9, %v1680_v12, %v1059_v55 }
 0xd7c   :  { %v1068_v44 = vsel %vm1065_vm10, %v1067_v38, %v1063_v57 }
 0xd7d   :  { %v1073_v60 = vmul.f32 %v1071_v58, %v1068_v44  ;;  %v1088_v61 = vmul.f32 %v1086_v56, %v1068_v44  ;;  %v1080_v32 = vsub.f32 1.0, %v1068_v44 }
 0xd7f   :  { %1075 = vrot.lane.b32.xlu0 %v1073_v60, %s1916_s5 }
 0xd84   :  { %v881_v63 = vpop.f32.mrf.mxu3 }
 0xd85   :  { %v882_v13 = vadd.f32 %v2118_v50, %v881_v63 }
 0xd87   :  { %997 = vrot.lane.b32.xlu1 %v882_v13, %s1916_s5  ;;  %v976_v14 = vadd.f32 %v2289_v36, %v882_v13 }
 0xd89   :  { %v1572_v46 = vmul.f32 -1.442695, %v976_v14 }
 0xd8b   :  { %1681 = vpow2.f32 %v1572_v46 }
 0xd91   :  { %v1682_v15 = vpop.eup %1681 }
 0xd92   :  { %v980_v20 = vadd.f32 1.0, %v1682_v15 }
 0xd94   :  { %1683 = vrcp.f32 %v980_v20  ;;  %v992_v6 = vand.u32 2147483648, %v980_v20  ;;  %vm986_vm12 = vweird.f32 %v980_v20  ;;  %v990_v2 = vand.u32 2147483647, %v980_v20 }
 0xd96   :  { %v993_v16 = vor.u32 1.1754944e-38, %v992_v6  ;;  %vm991_vm14 = vcmp.eq.f32.partialorder %v990_v2, 8.507059e+37 }
 0xd9a   :  { %v1684_v21 = vpop.eup %1683 }
 0xd9b   :  { %v982_v22 = vmul.f32 %v1684_v21, %v980_v20  ;;  %vm987_vm11 = vweird.f32 %v1684_v21 }
 0xd9c   :  { %vm988_vm13 = vmor %vm986_vm12, %vm987_vm11 }
 0xd9d   :  { %v983_v23 = vsub.f32 1.0, %v982_v22 }
 0xd9f   :  { %v984_v62 = vmul.f32 %v1684_v21, %v983_v23 }
 0xda1   :  { %v985_v27 = vadd.f32 %v1684_v21, %v984_v62 }
 0xda3   :  { %v989_v8 = vsel %vm988_vm13, %v1684_v21, %v985_v27 }
 0xda4   :  { %v994_v17 = vsel %vm991_vm14, %v993_v16, %v989_v8 }
 0xda5   :  { %v1007_v37 = vsub.f32 1.0, %v994_v17  ;;  %v1013_v39 = vmul.f32 %v994_v17, %v2284_v35 }
 0xdf1   :  { %v1076_v24 = vpop.permute.xlu0 %1075 }
 0xdf2   :  { %v1078_v26 = vadd.f32 %v1076_v24, %v2258_v30 }
 0xdf4   :  { %1685 = vtanh.f32 %v1078_v26 }
 0xdf9   :  { %v998_v29 = vpop.permute.xlu1 %997 }
 0xdfa   :  { %v1686_v28 = vpop.eup %1685  ;;  %v1000_v31 = vmul.f32 %v998_v29, %v994_v17 }
 0xdfb   :  { %1082 = vrot.lane.b32.xlu2 %v1686_v28, %s1917_s3 }
 0xdfc   :  { %1002 = vrot.lane.b32.xlu0 %v1000_v31, %s1916_s5 }
 0xe55   :  { %v1083_v33 = vpop.permute.xlu2 %1082 }
 0xe56   :  { %v1085_v34 = vmul.f32 %v1083_v33, %v1080_v32 }
 0xe58   :  { %v1089_v3 = vadd.f32 %v1088_v61, %v1085_v34 }
 0xe5a   :  { %v1091_v5 = vrot.slane %v1089_v3, 2  ;;  %v1246_v46 = vrot.slane %v1089_v3, 6 }
 0xe5c   :  { %1092 = vrot.lane.b32.xlu1 %v1091_v5, %s1917_s3 }
 0xe6e   :  { %v1003_v10 = vpop.permute.xlu0 %1002 }
 0xe6f   :  { %v1005_v1 = vadd.f32 %v1003_v10, %v2289_v36 }
 0xe71   :  { %1687 = vtanh.f32 %v1005_v1 }
 0xe77   :  { %v1688_v11 = vpop.eup %1687 }
 0xe78   :  { %1009 = vrot.lane.b32.xlu2 %v1688_v11, %s1917_s3 }
 0xece   :  { %v1093_v7 = vpop.permute.xlu1 %1092 }
 0xecf   :  { %1575 = vmatmul.msk.f32.vlgmr.msra.gmra.mxu3 %vm119_vm0, %v1093_v7  ;;  %1576 = vmatmul.msk.f32.vlgmr.msra.gmra.mxu0 %vm119_vm0, %v1093_v7 }
 0xed2   :  { %v1010_v4 = vpop.permute.xlu2 %1009 }
 0xed3   :  { %v1012_v9 = vmul.f32 %v1010_v4, %v1007_v37 }
 0xed5   :  { %v2313_v40 = vadd.f32 %v1013_v39, %v1012_v9 }
 0xed7   :  { %1016 = vrot.lane.b32.xlu0 %v2313_v40, %s1917_s3 }
 0xf49   :  { %v2317_v36 = vpop.permute.xlu0 %1016 }
 0xf4a   :  { %1573 = vmatmul.msk.f32.vlgmr.msra.gmra.mxu2 %vm119_vm0, %v2317_v36 }
 0xf4c   :  { %v1133_v42 = vpop.f32.mrf.mxu0 }
 0xf4d   :  { %v1134_v25 = vadd.f32 %v1133_v42, %v2032_v19 }
 0xf4f   :  { %v1203_v41 = vrot.slane %v1134_v25, 4 }
 0xf51   :  { %1206 = vrot.lane.b32.xlu2 %v1203_v41, %s1915_s2  ;;  %1230 = vrot.lane.b32.xlu0 %v1203_v41, %s1917_s3 }
 0xf52   :  { %v1113_v43 = vpop.f32.mrf.mxu3 }
 0xf53   :  { %v2325_v45 = vadd.f32 %v1113_v43, %v2025_v18 }
 0xf55   :  { %v1202_v47 = vrot.slane %v2325_v45, 4 }
 0xf57   :  { %1204 = vrot.lane.b32.xlu1 %v1202_v47, %s1915_s2 }
 0xfab   :  { %v1207_v12 = vpop.permute.xlu2 %1206 }
 0xfc9   :  { %v1205_v49 = vpop.permute.xlu1 %1204 }
 0xfca   :  { %v1208_v51 = vsel %vm119_vm0, %v1205_v49, %v1207_v12 }
 0xfcb   :  { %v1210_v52 = vadd.f32 %v1208_v51, %v2258_v30 }
 0xfcd   :  { %v1579_v53 = vmul.f32 -1.442695, %v1210_v52  ;;  %v1037_v54 = vpop.f32.mrf.mxu2 }
 0xfce   :  { %v1038_v55 = vadd.f32 %v2118_v50, %v1037_v54  ;;  %v1231_v50 = vpop.permute.xlu0 %1230 }
 0xfcf   :  { %1689 = vpow2.f32 %v1579_v53 }
 0xfd0   :  { %1157 = vrot.lane.b32.xlu1 %v1038_v55, %s1916_s5  ;;  %v1136_v23 = vadd.f32 %v2325_v45, %v1038_v55 }
 0xfd2   :  { %v1577_v62 = vmul.f32 -1.442695, %v1136_v23 }
 0xfd5   :  { %v1690_v38 = vpop.eup %1689 }
 0xfd6   :  { %v1214_v56 = vadd.f32 1.0, %v1690_v38 }
 0xfd8   :  { %1691 = vrcp.f32 %v1214_v56  ;;  %v1226_v60 = vand.u32 2147483648, %v1214_v56  ;;  %v1224_v63 = vand.u32 2147483647, %v1214_v56  ;;  %vm1220_vm1 = vweird.f32 %v1214_v56 }
 0xfd9   :  { %1693 = vpow2.f32 %v1577_v62 }
 0xfda   :  { %v1227_v14 = vor.u32 1.1754944e-38, %v1226_v60  ;;  %vm1225_vm3 = vcmp.eq.f32.partialorder %v1224_v63, 8.507059e+37 }
 0xfde   :  { %v1692_v57 = vpop.eup %1691 }
 0xfdf   :  { %v1216_v58 = vmul.f32 %v1692_v57, %v1214_v56  ;;  %vm1221_vm15 = vweird.f32 %v1692_v57  ;;  %v1694_v24 = vpop.eup %1693  ;;  %v2360_v56 = vld [vmem:[%s2409_s7] ss:$0 sm:$0xff]  ;;  %s1918_s7 = smov [#allocation11]  }
 0xfe0   :  { %vm1222_vm2 = vmor %vm1220_vm1, %vm1221_vm15  ;;  %v1140_v26 = vadd.f32 1.0, %v1694_v24  ;;  %s1515_s21 = sshll.u32 %s1918_s7, 4  ;;  %s1516_s21 = int_to_ptr.vmem [resolvable:$true] %s1515_s21 }
 0xfe1   :  { %v1217_v44 = vsub.f32 1.0, %v1216_v58 }
 0xfe2   :  { %1695 = vrcp.f32 %v1140_v26  ;;  %v1152_v17 = vand.u32 2147483648, %v1140_v26  ;;  %vm1146_vm5 = vweird.f32 %v1140_v26  ;;  %v1150_v29 = vand.u32 2147483647, %v1140_v26 }
 0xfe3   :  { %v1218_v61 = vmul.f32 %v1692_v57, %v1217_v44 }
 0xfe4   :  { %v1153_v31 = vor.u32 1.1754944e-38, %v1152_v17  ;;  %vm1151_vm7 = vcmp.eq.f32.partialorder %v1150_v29, 8.507059e+37 }
 0xfe5   :  { %v1219_v13 = vadd.f32 %v1692_v57, %v1218_v61 }
 0xfe7   :  { %v1223_v15 = vsel %vm1222_vm2, %v1692_v57, %v1219_v13 }
 0xfe8   :  { %v1228_v20 = vsel %vm1225_vm3, %v1227_v14, %v1223_v15  ;;  %v1696_v27 = vpop.eup %1695 }
 0xfe9   :  { %v1233_v21 = vmul.f32 %v1231_v50, %v1228_v20  ;;  %v1248_v22 = vmul.f32 %v1246_v46, %v1228_v20  ;;  %v1142_v6 = vmul.f32 %v1696_v27, %v1140_v26  ;;  %vm1147_vm4 = vweird.f32 %v1696_v27 }
 0xfea   :  { %vm1148_vm6 = vmor %vm1146_vm5, %vm1147_vm4  ;;  %v1240_v37 = vsub.f32 1.0, %v1228_v20  ;;  %vm1491_vm5 = vcmask 523264  }
 0xfeb   :  { %1235 = vrot.lane.b32.xlu2 %v1233_v21, %s1916_s5  ;;  %v1143_v2 = vsub.f32 1.0, %v1142_v6 }
 0xfed   :  { %v1144_v8 = vmul.f32 %v1696_v27, %v1143_v2 }
 0xfef   :  { %v1145_v16 = vadd.f32 %v1696_v27, %v1144_v8 }
 0xff1   :  { %v1149_v28 = vsel %vm1148_vm6, %v1696_v27, %v1145_v16  ;;  %vm1493_vm6 = vcmask 785408  }
 0xff2   :  { %v1154_v33 = vsel %vm1151_vm7, %v1153_v31, %v1149_v28  ;;  %vm1501_vm7 = vcmask 1041408  }
 0xff3   :  { %v1167_v25 = vsub.f32 1.0, %v1154_v33  ;;  %v1173_v43 = vmul.f32 %v1154_v33, %v2313_v40 }
0x1042   :  { %v1158_v32 = vpop.permute.xlu1 %1157 }
0x1043   :  { %v1160_v34 = vmul.f32 %v1158_v32, %v1154_v33 }
0x1045   :  { %1162 = vrot.lane.b32.xlu0 %v1160_v34, %s1916_s5  ;;  %v1236_v3 = vpop.permute.xlu2 %1235 }
0x1046   :  { %v1238_v5 = vadd.f32 %v1236_v3, %v2258_v30 }
0x1048   :  { %1697 = vtanh.f32 %v1238_v5 }
0x104e   :  { %v1698_v10 = vpop.eup %1697 }
0x104f   :  { %1242 = vrot.lane.b32.xlu1 %v1698_v10, %s1917_s3 }
0x10b7   :  { %v1163_v1 = vpop.permute.xlu0 %1162 }
0x10b8   :  { %v1165_v11 = vadd.f32 %v1163_v1, %v2325_v45 }
0x10ba   :  { %1699 = vtanh.f32 %v1165_v11 }
0x10c0   :  { %v1700_v7 = vpop.eup %1699 }
0x10c1   :  { %1169 = vrot.lane.b32.xlu2 %v1700_v7, %s1917_s3  ;;  %v1243_v4 = vpop.permute.xlu1 %1242 }
0x10c2   :  { %v1245_v39 = vmul.f32 %v1243_v4, %v1240_v37 }
0x10c4   :  { %v1249_v9 = vadd.f32 %v1248_v22, %v1245_v39 }
0x10c6   :  { %v1251_v42 = vrot.slane %v1249_v9, 4  ;;  %v1406_v62 = vrot.slane %v1249_v9, 6 }
0x10c8   :  { %1252 = vrot.lane.b32.xlu0 %v1251_v42, %s1917_s3 }
0x111b   :  { %v1170_v41 = vpop.permute.xlu2 %1169 }
0x111c   :  { %v1172_v47 = vmul.f32 %v1170_v41, %v1167_v25 }
0x111e   :  { %v2342_v12 = vadd.f32 %v1173_v43, %v1172_v47 }
0x1120   :  { %1176 = vrot.lane.b32.xlu1 %v2342_v12, %s1917_s3 }
0x113a   :  { %v1253_v45 = vpop.permute.xlu0 %1252 }
0x113b   :  { %1580 = vmatmul.msk.f32.vlgmr.msrb.gmra.mxu2 %vm119_vm0, %v1253_v45  ;;  %1581 = vmatmul.msk.f32.vlgmr.msrb.gmra.mxu3 %vm119_vm0, %v1253_v45 }
0x1192   :  { %v1177_v49 = vpop.permute.xlu1 %1176 }
0x1193   :  { %1578 = vmatmul.msk.f32.vlgmr.msrb.gmra.mxu1 %vm119_vm0, %v1177_v49 }
0x11be   :  { %v1273_v51 = vpop.f32.mrf.mxu2  ;;  %v1293_v52 = vpop.f32.mrf.mxu3 }
0x11bf   :  { %v2350_v53 = vadd.f32 %v1273_v51, %v2025_v18  ;;  %v1294_v40 = vadd.f32 %v1293_v52, %v2032_v19 }
0x11c1   :  { %v1363_v54 = vrot.slane %v1294_v40, 2  ;;  %v1362_v55 = vrot.slane %v2350_v53, 2 }
0x11c3   :  { %1366 = vrot.lane.b32.xlu0 %v1363_v54, %s1915_s2  ;;  %1364 = vrot.lane.b32.xlu2 %v1362_v55, %s1915_s2 }
0x11cb   :  { %1390 = vrot.lane.b32.xlu2 %v1363_v54, %s1917_s3 }
0x1210   :  { %v1197_v38 = vpop.f32.mrf.mxu1 }
0x1211   :  { %v1198_v57 = vadd.f32 %v2360_v56, %v1197_v38 }
0x1213   :  { %1317 = vrot.lane.b32.xlu1 %v1198_v57, %s1916_s5  ;;  %v1296_v26 = vadd.f32 %v2350_v53, %v1198_v57 }
0x1215   :  { %v1582_v16 = vmul.f32 -1.442695, %v1296_v26 }
0x121d   :  { %v1365_v19 = vpop.permute.xlu2 %1364 }
0x1225   :  { %v1391_v27 = vpop.permute.xlu2 %1390 }
0x1235   :  { %v1367_v58 = vpop.permute.xlu0 %1366 }
0x1236   :  { %v1368_v44 = vsel %vm119_vm0, %v1365_v19, %v1367_v58 }
0x1237   :  { %v1370_v60 = vadd.f32 %v1368_v44, %v2258_v30 }
0x1239   :  { %v1584_v61 = vmul.f32 -1.442695, %v1370_v60 }
0x123b   :  { %1701 = vpow2.f32 %v1584_v61 }
0x1241   :  { %v1702_v63 = vpop.eup %1701 }
0x1242   :  { %v1374_v13 = vadd.f32 1.0, %v1702_v63 }
0x1244   :  { %1703 = vrcp.f32 %v1374_v13  ;;  %v1386_v50 = vand.u32 2147483648, %v1374_v13  ;;  %v1384_v21 = vand.u32 2147483647, %v1374_v13  ;;  %vm1380_vm9 = vweird.f32 %v1374_v13 }
0x1245   :  { %1705 = vpow2.f32 %v1582_v16 }
0x1246   :  { %v1387_v23 = vor.u32 1.1754944e-38, %v1386_v50  ;;  %vm1385_vm11 = vcmp.eq.f32.partialorder %v1384_v21, 8.507059e+37 }
0x124a   :  { %v1704_v14 = vpop.eup %1703 }
0x124b   :  { %v1376_v46 = vmul.f32 %v1704_v14, %v1374_v13  ;;  %vm1381_vm8 = vweird.f32 %v1704_v14  ;;  %v1706_v17 = vpop.eup %1705 }
0x124c   :  { %vm1382_vm10 = vmor %vm1380_vm9, %vm1381_vm8  ;;  %v1300_v29 = vadd.f32 1.0, %v1706_v17 }
0x124d   :  { %v1377_v15 = vsub.f32 1.0, %v1376_v46 }
0x124e   :  { %1707 = vrcp.f32 %v1300_v29  ;;  %v1312_v3 = vand.u32 2147483648, %v1300_v29  ;;  %vm1306_vm13 = vweird.f32 %v1300_v29  ;;  %v1310_v5 = vand.u32 2147483647, %v1300_v29 }
0x124f   :  { %v1378_v20 = vmul.f32 %v1704_v14, %v1377_v15 }
0x1250   :  { %v1313_v1 = vor.u32 1.1754944e-38, %v1312_v3  ;;  %vm1311_vm15 = vcmp.eq.f32.partialorder %v1310_v5, 8.507059e+37 }
0x1251   :  { %v1379_v22 = vadd.f32 %v1704_v14, %v1378_v20 }
0x1253   :  { %v1383_v24 = vsel %vm1382_vm10, %v1704_v14, %v1379_v22 }
0x1254   :  { %v1388_v6 = vsel %vm1385_vm11, %v1387_v23, %v1383_v24  ;;  %v1708_v28 = vpop.eup %1707 }
0x1255   :  { %v1393_v2 = vmul.f32 %v1391_v27, %v1388_v6  ;;  %v1408_v8 = vmul.f32 %v1406_v62, %v1388_v6  ;;  %v1302_v31 = vmul.f32 %v1708_v28, %v1300_v29  ;;  %vm1307_vm12 = vweird.f32 %v1708_v28 }
0x1256   :  { %vm1308_vm14 = vmor %vm1306_vm13, %vm1307_vm12  ;;  %v1400_v43 = vsub.f32 1.0, %v1388_v6 }
0x1257   :  { %1395 = vrot.lane.b32.xlu1 %v1393_v2, %s1916_s5  ;;  %v1303_v32 = vsub.f32 1.0, %v1302_v31  ;;  %v1495_v31 = vsel %vm119_vm0, %v2317_v36, %v2342_v12 }
0x1259   :  { %v1304_v33 = vmul.f32 %v1708_v28, %v1303_v32 }
0x125b   :  { %v1305_v34 = vadd.f32 %v1708_v28, %v1304_v33 }
0x125d   :  { %v1309_v10 = vsel %vm1308_vm14, %v1708_v28, %v1305_v34 }
0x125e   :  { %v1314_v7 = vsel %vm1311_vm15, %v1313_v1, %v1309_v10 }
0x125f   :  { %v1327_v52 = vsub.f32 1.0, %v1314_v7  ;;  %v1333_v40 = vmul.f32 %v1314_v7, %v2342_v12 }
0x1285   :  { %v1318_v11 = vpop.permute.xlu1 %1317 }
0x1286   :  { %v1320_v37 = vmul.f32 %v1318_v11, %v1314_v7 }
0x1288   :  { %1322 = vrot.lane.b32.xlu0 %v1320_v37, %s1916_s5 }
0x12c9   :  { %v1396_v4 = vpop.permute.xlu1 %1395 }
0x12ca   :  { %v1398_v39 = vadd.f32 %v1396_v4, %v2258_v30 }
0x12cc   :  { %1709 = vtanh.f32 %v1398_v39 }
0x12d2   :  { %v1710_v9 = vpop.eup %1709 }
0x12d3   :  { %1402 = vrot.lane.b32.xlu0 %v1710_v9, %s1917_s3 }
0x12fa   :  { %v1323_v42 = vpop.permute.xlu0 %1322 }
0x12fb   :  { %v1325_v25 = vadd.f32 %v1323_v42, %v2350_v53 }
0x12fd   :  { %1711 = vtanh.f32 %v1325_v25 }
0x1303   :  { %v1712_v41 = vpop.eup %1711 }
0x1304   :  { %1329 = vrot.lane.b32.xlu2 %v1712_v41, %s1917_s3 }
0x1345   :  { %v1403_v47 = vpop.permute.xlu0 %1402 }
0x1346   :  { %v1405_v45 = vmul.f32 %v1403_v47, %v1400_v43 }
0x1348   :  { %v1409_v49 = vadd.f32 %v1408_v8, %v1405_v45 }
0x134a   :  { %v1411_v51 = vrot.slane %v1409_v49, 6 }
0x134c   :  { %1412 = vrot.lane.b32.xlu2 %v1411_v51, %s1917_s3 }
0x135e   :  { %v1330_v30 = vpop.permute.xlu2 %1329 }
0x135f   :  { %v1332_v54 = vmul.f32 %v1330_v30, %v1327_v52 }
0x1361   :  { %v1334_v55 = vadd.f32 %v1333_v40, %v1332_v54 }
0x1363   :  { %1336 = vrot.lane.b32.xlu1 %v1334_v55, %s1917_s3 }
0x13a6   :  { %v1413_v53 = vpop.permute.xlu2 %1412 }
0x13a7   :  { %1585 = vmatmul.msk.f32.vlgmr.msra.gmra.mxu1 %vm119_vm0, %v1413_v53 }
0x13d5   :  { %v1337_v38 = vpop.permute.xlu1 %1336 }
0x13d6   :  { %1583 = vmatmul.msk.f32.vlgmr.msrb.gmra.mxu0 %vm119_vm0, %v1337_v38 }
0x1424   :  { %v1433_v58 = vpop.f32.mrf.mxu1 }
0x1425   :  { %v1434_v44 = vadd.f32 %v1433_v58, %v2025_v18 }
0x1453   :  { %v1357_v57 = vpop.f32.mrf.mxu0 }
0x1454   :  { %v1358_v19 = vadd.f32 %v2360_v56, %v1357_v57 }
0x1456   :  { %1457 = vrot.lane.b32.xlu0 %v1358_v19, %s1916_s5  ;;  %v1436_v60 = vadd.f32 %v1434_v44, %v1358_v19 }
0x1458   :  { %v1586_v61 = vmul.f32 -1.442695, %v1436_v60 }
0x145a   :  { %1713 = vpow2.f32 %v1586_v61 }
0x145e   :  { %1483 = vrot.lane.b32.xlu0 %v1334_v55, %s1915_s2 }
0x1460   :  { %v1714_v63 = vpop.eup %1713 }
0x1461   :  { %v1440_v13 = vadd.f32 1.0, %v1714_v63 }
0x1463   :  { %1715 = vrcp.f32 %v1440_v13  ;;  %v1452_v20 = vand.u32 2147483648, %v1440_v13  ;;  %vm1446_vm2 = vweird.f32 %v1440_v13  ;;  %v1450_v21 = vand.u32 2147483647, %v1440_v13 }
0x1465   :  { %v1453_v22 = vor.u32 1.1754944e-38, %v1452_v20  ;;  %vm1451_vm4 = vcmp.eq.f32.partialorder %v1450_v21, 8.507059e+37 }
0x1466   :  { %1479 = vrot.lane.b32.xlu0 %v2284_v35, %s1916_s5 }
0x1469   :  { %v1716_v14 = vpop.eup %1715 }
0x146a   :  { %v1442_v46 = vmul.f32 %v1716_v14, %v1440_v13  ;;  %vm1447_vm1 = vweird.f32 %v1716_v14 }
0x146b   :  { %vm1448_vm3 = vmor %vm1446_vm2, %vm1447_vm1 }
0x146c   :  { %v1443_v15 = vsub.f32 1.0, %v1442_v46 }
0x146e   :  { %v1444_v56 = vmul.f32 %v1716_v14, %v1443_v15 }
0x1470   :  { %v1445_v50 = vadd.f32 %v1716_v14, %v1444_v56 }
0x1472   :  { %v1449_v35 = vsel %vm1448_vm3, %v1716_v14, %v1445_v50 }
0x1473   :  { %v1454_v23 = vsel %vm1451_vm4, %v1453_v22, %v1449_v35 }
0x1474   :  { %v1467_v6 = vsub.f32 1.0, %v1454_v23  ;;  %v1473_v8 = vmul.f32 %v1454_v23, %v1334_v55 }
0x14c8   :  { %v1458_v18 = vpop.permute.xlu0 %1457 }
0x14c9   :  { %v1460_v62 = vmul.f32 %v1458_v18, %v1454_v23 }
0x14cb   :  { %1462 = vrot.lane.b32.xlu1 %v1460_v62, %s1916_s5 }
0x14d0   :  { %v1484_v29 = vpop.permute.xlu0 %1483 }
0x14d1   :  { %v1496_v32 = vsel %vm1491_vm5, %v1495_v31, %v1484_v29 }
0x14d8   :  { %v1480_v5 = vpop.permute.xlu0 %1479 }
0x153d   :  { %v1463_v24 = vpop.permute.xlu1 %1462 }
0x153e   :  { %v1465_v26 = vadd.f32 %v1463_v24, %v1434_v44 }
0x1540   :  { %1717 = vtanh.f32 %v1465_v26 }
0x1546   :  { %v1718_v27 = vpop.eup %1717 }
0x1547   :  { %1469 = vrot.lane.b32.xlu2 %v1718_v27, %s1917_s3 }
0x154f   :  { %1476 = vrot.lane.b32.xlu2 %v2239_v0, %s1915_s2  ;;  %v1490_v0 = vsel %vm119_vm0, %v2158_v48, %v2193_v59  ;;  %vm1508_vm0 = vcmask 254976  }
0x15a1   :  { %v1470_v2 = vpop.permute.xlu2 %1469 }
0x15a2   :  { %v1472_v16 = vmul.f32 %v1470_v2, %v1467_v6 }
0x15a4   :  { %v1474_v17 = vadd.f32 %v1473_v8, %v1472_v16 }
0x15a6   :  { %1487 = vrot.lane.b32.xlu1 %v1474_v17, %s1916_s5 }
0x15a9   :  { %v1477_v28 = vpop.permute.xlu2 %1476 }
0x15aa   :  { %v1492_v33 = vsel %vm1491_vm5, %v1490_v0, %v1477_v28 }
0x15ab   :  { %v1494_v1 = vsel %vm1493_vm6, %v1492_v33, %v1480_v5 }
0x15ae   :  { %1505 = vrot.lane.b32.xlu1 %v1474_v17, %s1917_s3 }
0x1618   :  { %v1488_v34 = vpop.permute.xlu1 %1487 }
0x1619   :  { %v1497_v3 = vsel %vm1493_vm6, %v1496_v32, %v1488_v34 }
0x161a   :  { %v1500_v10 = vrot.slane %v1497_v3, 6 }
0x161c   :  { %v1502_v36 = vsel %vm1501_vm7, %v1494_v1, %v1500_v10 }
0x161d   :  { %1504 = vst [vmem:[#allocation11] sm:$0xf] %v1502_v36 }
0x161e   :  { %1520 = dma.vmem_to_hbm [thread:$0]  %s1516_s21, 64, %s1518_s23, [#allocation4]  }
0x1620   :  { %v1506_v48 = vpop.permute.xlu1 %1505 }
0x1621   :  { %1509 = vst.msk [vmem:[#allocation12] sm:$0x3] %vm1508_vm0, %v1506_v48 }
0x1622   :  { %1531 = dma.vmem_to_hbm [thread:$0]  %s1527_s25, 32, %s1529_s27, [#allocation13]  }
0x1623   :  { %1902 = dma.done.wait [#allocation4], 64  }
0x1624   :  { %1903 = vsyncadd [#allocation4], 4294967232 }
0x1625   :  { %1904 = dma.done.wait [#allocation13], 32  }
0x1626   :  { %1905 = vsyncadd [#allocation13], 4294967264 }
0x1627   :  { %1540 = vsyncpa [#allocation3], 1 }
0x1628   :  { %1541 = vsyncpa [#allocation6], 1 }
0x1629   :  { %1542 = vsyncpa [#allocation9], 1 }
0x162a   :  { %1543 = vsyncpa [#allocation4], 1 }
0x162b   :  { %1544 = vsyncpa [#allocation13], 1 }

</bundles_post_ra>
